<compile_context>
chip_gen: v7x
topology: tpu7x:2x2x1
jax: 0.10.0
libtpu: 0.0.40
codegen_flags: <defaults>
</compile_context>

<pallas_src>
import functools

import jax
import jax.numpy as jnp
import numpy as np
from jax.experimental import pallas as pl
from jax.experimental.pallas import tpu as pltpu


def _residual_block_kernel(x_ref, m1_ref, b1_ref, m2_ref, b2_ref, o_ref,
                           xpad_ref, hpad_ref, *, B, H, W, Cin, Co):
    """Processes B images per grid step in a folded (rows, width*channel) layout.

    x_ref:    (B, H, W*Cin)       bf16  input images (lane-dense)
    m1_ref:   (3, W*Cin, W*Co)    bf16  conv1 block-Toeplitz weights (BN1 scale + width halo folded)
    b1_ref:   (1, W*Co)           f32   conv1 folded bias (conv bias + BN1)
    m2_ref:   (3, W*Co,  W*Co)    bf16  conv2 block-Toeplitz weights (BN2 scale + width halo folded)
    b2_ref:   (1, W*Co)           f32   conv2 folded bias
    o_ref:    (B, H, W*Co)        f32   output
    xpad_ref: (B*(H+2), W*Cin)    bf16  VMEM: B slabs of [1 zero row | H image rows | 1 zero row]
    hpad_ref: (B*(H+2), W*Co)     bf16  VMEM: same slab layout for the intermediate activation
    """
    Hp = H + 2
    R = B * Hp - 2  # rows per fat matmul; rows straddling slab boundaries are junk and discarded

    # ---- stage 0: zero only the halo rows, copy each image into its slab interior ----
    zx = jnp.zeros((1, W * Cin), xpad_ref.dtype)
    zh = jnp.zeros((1, W * Co), hpad_ref.dtype)
    for b in range(B):
        xpad_ref[pl.ds(b * Hp, 1), :] = zx
        xpad_ref[pl.ds(b * Hp + H + 1, 1), :] = zx
        hpad_ref[pl.ds(b * Hp, 1), :] = zh
        hpad_ref[pl.ds(b * Hp + H + 1, 1), :] = zh
        xpad_ref[pl.ds(b * Hp + 1, H), :] = x_ref[b]

    # ---- stage 1: conv1 + folded BN1 + ReLU (3 MXU matmuls, K = W*Cin, f32 accumulation) ----
    acc1 = jnp.zeros((R, W * Co), jnp.float32)
    for kh in range(3):
        acc1 = acc1 + jnp.dot(xpad_ref[pl.ds(kh, R), :], m1_ref[kh],
                              preferred_element_type=jnp.float32)
    h = jnp.maximum(acc1 + b1_ref[...], 0.0).astype(hpad_ref.dtype)
    for b in range(B):
        hpad_ref[pl.ds(b * Hp + 1, H), :] = h[b * Hp:b * Hp + H, :]

    # ---- stage 2: conv2 + folded BN2 + residual add + ReLU ----
    acc2 = jnp.zeros((R, W * Co), jnp.float32)
    for kh in range(3):
        acc2 = acc2 + jnp.dot(hpad_ref[pl.ds(kh, R), :], m2_ref[kh],
                              preferred_element_type=jnp.float32)
    acc2 = acc2 + b2_ref[...]
    for b in range(B):
        res = x_ref[b].astype(jnp.float32)  # identity residual (Cin == Co, stride 1)
        o_ref[b] = jnp.maximum(acc2[b * Hp:b * Hp + H, :] + res, 0.0).astype(o_ref.dtype)


def _toeplitz_conv_weights(w, scale, W):
    """(3,3,Cin,Co) conv weights * per-channel scale -> (3, W*Cin, W*Co) band matrix.

    The width halo is folded in: blocks that would read out-of-range columns stay zero, so
        out_fold[h] = sum_kh rowpad_fold[h + kh, :] @ M[kh]
    is a stride-1 SAME 3x3 convolution in the folded (row, width*channel) layout with K = W*Cin.
    """
    Kh, Kw, Cin, Co = w.shape
    pad = (Kw - 1) // 2
    wf = (w * scale[None, None, None, :]).astype(jnp.float32)
    M = jnp.zeros((Kh, W * Cin, W * Co), jnp.float32)
    # TODO(synk): O(Kw*W) trace-time .at[].set and O(W^2*Cin*Co) memory; for realistic feature
    #             maps build/consume column tiles of M instead of the full matrix.
    for kw in range(Kw):
        for wi in range(W):
            src = wi + kw - pad
            if 0 <= src < W:
                M = M.at[:, src * Cin:(src + 1) * Cin, wi * Co:(wi + 1) * Co].set(wf[:, kw])
    return M


def fold_bn(conv_bias, gamma, beta, mean, var, eps=1e-5):
    """Fold conv bias + eval-mode BatchNorm into per-channel (scale, bias)."""
    scale = gamma / jnp.sqrt(var + eps)
    bias = beta + scale * (conv_bias - mean)
    return scale, bias


def _pick_images_per_step(N, H, max_rows=512):
    """Largest divisor B of N with B*(H+2) <= max_rows, preferring a grid of >= 2 steps."""
    best = 1
    for d in range(1, N + 1):
        if N % d:
            continue
        if d * (H + 2) > max_rows:
            break
        if N // d >= 2 or N == 1:
            best = d
    return best


def residual_block_forward(x, p, eps=1e-5, images_per_step=None):
    """Fused Pallas implementation of ResidualBlock.forward (stride=1, no downsample). NHWC in/out."""
    N, H, W, Cin = x.shape
    Co = p["w1"].shape[-1]
    assert Cin == Co, "identity residual requires in_channels == out_channels"

    B = images_per_step if images_per_step is not None else _pick_images_per_step(N, H)
    assert N % B == 0, "batch must be divisible by images_per_step"

    s1, b1 = fold_bn(p["cb1"], p["g1"], p["be1"], p["m1"], p["v1"], eps)
    s2, b2 = fold_bn(p["cb2"], p["g2"], p["be2"], p["m2"], p["v2"], eps)

    m1 = _toeplitz_conv_weights(p["w1"], s1, W).astype(jnp.bfloat16)   # (3, W*Cin, W*Co)
    m2 = _toeplitz_conv_weights(p["w2"], s2, W).astype(jnp.bfloat16)   # (3, W*Co,  W*Co)
    b1t = jnp.tile(b1.astype(jnp.float32), W).reshape(1, W * Co)
    b2t = jnp.tile(b2.astype(jnp.float32), W).reshape(1, W * Co)

    x_fold = x.astype(jnp.bfloat16).reshape(N, H, W * Cin)  # free, contiguous reshape

    kernel = functools.partial(_residual_block_kernel, B=B, H=H, W=W, Cin=Cin, Co=Co)

    out_fold = pl.pallas_call(
        kernel,
        out_shape=jax.ShapeDtypeStruct((N, H, W * Co), jnp.float32),
        grid_spec=pltpu.PrefetchScalarGridSpec(
            num_scalar_prefetch=0,
            grid=(N // B,),
            in_specs=[
                pl.BlockSpec((B, H, W * Cin), lambda n: (n, 0, 0)),
                # Constant index_maps: weights/biases are fetched once and stay VMEM-resident.
                pl.BlockSpec((3, W * Cin, W * Co), lambda n: (0, 0, 0)),
                pl.BlockSpec((1, W * Co), lambda n: (0, 0)),
                pl.BlockSpec((3, W * Co, W * Co), lambda n: (0, 0, 0)),
                pl.BlockSpec((1, W * Co), lambda n: (0, 0)),
            ],
            out_specs=pl.BlockSpec((B, H, W * Co), lambda n: (n, 0, 0)),
            scratch_shapes=[
                pltpu.VMEM((B * (H + 2), W * Cin), jnp.bfloat16),
                pltpu.VMEM((B * (H + 2), W * Co), jnp.bfloat16),
            ],
        ),
        compiler_params=pltpu.CompilerParams(
            dimension_semantics=("parallel",),
            vmem_limit_bytes=32 * 1024 * 1024,
        ),
    )(x_fold, m1, b1t, m2, b2t)

    return out_fold.reshape(N, H, W, Co)


def residual_block_reference(x, p, eps=1e-5):
    """Pure-JAX reference matching PyTorch eval-mode semantics (NHWC)."""
    def conv(x, w, b):
        y = jax.lax.conv_general_dilated(
            x, w, window_strides=(1, 1), padding="SAME",
            dimension_numbers=("NHWC", "HWIO", "NHWC"))
        return y + b
    def bn(y, g, be, m, v):
        return (y - m) / jnp.sqrt(v + eps) * g + be
    h = jax.nn.relu(bn(conv(x, p["w1"], p["cb1"]), p["g1"], p["be1"], p["m1"], p["v1"]))
    o = bn(conv(h, p["w2"], p["cb2"]), p["g2"], p["be2"], p["m2"], p["v2"])
    return jax.nn.relu(o + x)


def init_params(key, cin, cout):
    ks = jax.random.split(key, 12)
    return {
        "w1": jax.random.normal(ks[0], (3, 3, cin, cout), jnp.float32) * 0.1,
        "cb1": jax.random.normal(ks[1], (cout,), jnp.float32) * 0.1,
        "g1": jax.random.uniform(ks[2], (cout,), jnp.float32, 0.5, 1.5),
        "be1": jax.random.normal(ks[3], (cout,), jnp.float32) * 0.1,
        "m1": jax.random.normal(ks[4], (cout,), jnp.float32) * 0.1,
        "v1": jax.random.uniform(ks[5], (cout,), jnp.float32, 0.5, 1.5),
        "w2": jax.random.normal(ks[6], (3, 3, cout, cout), jnp.float32) * 0.1,
        "cb2": jax.random.normal(ks[7], (cout,), jnp.float32) * 0.1,
        "g2": jax.random.uniform(ks[8], (cout,), jnp.float32, 0.5, 1.5),
        "be2": jax.random.normal(ks[9], (cout,), jnp.float32) * 0.1,
        "m2": jax.random.normal(ks[10], (cout,), jnp.float32) * 0.1,
        "v2": jax.random.uniform(ks[11], (cout,), jnp.float32, 0.5, 1.5),
    }


if __name__ == "__main__":
    # in_channels == out_channels, stride=1, no downsample; W*C = 128 -> exact MXU lane width.
    # N=16 -> 8 images per grid step: fat-matmul M = 8*(16+2)-2 = 142 rows, 2 "parallel" grid
    # steps so both v7x TensorCores get work.
    N, H, W, C = 16, 16, 16, 8
    key = jax.random.PRNGKey(0)
    kx, kp = jax.random.split(key)
    x = jax.random.normal(kx, (N, H, W, C), jnp.float32)
    params = init_params(kp, C, C)

    out = jax.block_until_ready(residual_block_forward(x, params))
    ref = jax.block_until_ready(residual_block_reference(x, params))
    # bf16 MXU operands (f32 accumulation) -> looser tolerance than the pure-f32 version.
    np.testing.assert_allclose(np.asarray(out), np.asarray(ref), atol=5e-2, rtol=5e-2)

    print("KERNEL_OK")
</pallas_src>

<mosaic_0001>
module attributes {stable_mosaic.version = 11 : i64} {
  func.func @_residual_block_kernel(%arg0: i32, %arg1: memref<8x16x128xbf16, #tpu.memory_space<vmem>>, %arg2: memref<3x128x128xbf16, #tpu.memory_space<vmem>>, %arg3: memref<1x128xf32, #tpu.memory_space<vmem>>, %arg4: memref<3x128x128xbf16, #tpu.memory_space<vmem>>, %arg5: memref<1x128xf32, #tpu.memory_space<vmem>>, %arg6: memref<8x16x128xf32, #tpu.memory_space<vmem>>, %arg7: memref<144x128xbf16, #tpu.memory_space<vmem>>, %arg8: memref<144x128xbf16, #tpu.memory_space<vmem>>) attributes {dimension_semantics = [#tpu.dimension_semantics<parallel>], iteration_bounds = array<i64: 2>, scalar_prefetch = 0 : i64, scratch_operands = 2 : i64, tpu.core_type = #tpu.core_type<tc>, window_params = [{transform_indices = @transform_0, window_bounds = array<i64: 8, 16, 128>}, {pipeline_mode = #tpu.pipeline_mode<synchronous>, transform_indices = @transform_1, window_bounds = array<i64: 3, 128, 128>}, {pipeline_mode = #tpu.pipeline_mode<synchronous>, transform_indices = @transform_2, window_bounds = array<i64: 1, 128>}, {pipeline_mode = #tpu.pipeline_mode<synchronous>, transform_indices = @transform_3, window_bounds = array<i64: 3, 128, 128>}, {pipeline_mode = #tpu.pipeline_mode<synchronous>, transform_indices = @transform_4, window_bounds = array<i64: 1, 128>}, {transform_indices = @transform_5, window_bounds = array<i64: 8, 16, 128>}]} {
    %cst = arith.constant 0.000000e+00 : bf16
    %0 = vector.broadcast %cst : bf16 to vector<1x128xbf16>
    %cst_0 = arith.constant 0.000000e+00 : bf16
    %1 = vector.broadcast %cst_0 : bf16 to vector<1x128xbf16>
    %c0 = arith.constant 0 : index
    %c0_1 = arith.constant 0 : index
    %2 = vector.load %arg7[%c0, %c0_1] : memref<144x128xbf16, #tpu.memory_space<vmem>>, vector<1x128xbf16>
    tpu.vector_store %arg7[%c0, %c0_1], %0 {strides = array<i32>} : memref<144x128xbf16, #tpu.memory_space<vmem>>, vector<1x128xbf16>,
    %c17 = arith.constant 17 : index
    %c0_2 = arith.constant 0 : index
    %3 = vector.load %arg7[%c17, %c0_2] : memref<144x128xbf16, #tpu.memory_space<vmem>>, vector<1x128xbf16>
    tpu.vector_store %arg7[%c17, %c0_2], %0 {strides = array<i32>} : memref<144x128xbf16, #tpu.memory_space<vmem>>, vector<1x128xbf16>,
    %c0_3 = arith.constant 0 : index
    %c0_4 = arith.constant 0 : index
    %4 = vector.load %arg8[%c0_3, %c0_4] : memref<144x128xbf16, #tpu.memory_space<vmem>>, vector<1x128xbf16>
    tpu.vector_store %arg8[%c0_3, %c0_4], %1 {strides = array<i32>} : memref<144x128xbf16, #tpu.memory_space<vmem>>, vector<1x128xbf16>,
    %c17_5 = arith.constant 17 : index
    %c0_6 = arith.constant 0 : index
    %5 = vector.load %arg8[%c17_5, %c0_6] : memref<144x128xbf16, #tpu.memory_space<vmem>>, vector<1x128xbf16>
    tpu.vector_store %arg8[%c17_5, %c0_6], %1 {strides = array<i32>} : memref<144x128xbf16, #tpu.memory_space<vmem>>, vector<1x128xbf16>,
    %c0_7 = arith.constant 0 : index
    %c0_8 = arith.constant 0 : index
    %c0_9 = arith.constant 0 : index
    %6 = vector.load %arg1[%c0_7, %c0_8, %c0_9] : memref<8x16x128xbf16, #tpu.memory_space<vmem>>, vector<1x16x128xbf16>
    %7 = vector.shape_cast %6 : vector<1x16x128xbf16> to vector<16x128xbf16>
    %c1 = arith.constant 1 : index
    %c0_10 = arith.constant 0 : index
    %8 = vector.load %arg7[%c1, %c0_10] : memref<144x128xbf16, #tpu.memory_space<vmem>>, vector<16x128xbf16>
    tpu.vector_store %arg7[%c1, %c0_10], %7 {strides = array<i32>} : memref<144x128xbf16, #tpu.memory_space<vmem>>, vector<16x128xbf16>,
    %c18 = arith.constant 18 : index
    %c0_11 = arith.constant 0 : index
    %9 = vector.load %arg7[%c18, %c0_11] : memref<144x128xbf16, #tpu.memory_space<vmem>>, vector<1x128xbf16>
    tpu.vector_store %arg7[%c18, %c0_11], %0 {strides = array<i32>} : memref<144x128xbf16, #tpu.memory_space<vmem>>, vector<1x128xbf16>,
    %c35 = arith.constant 35 : index
    %c0_12 = arith.constant 0 : index
    %10 = vector.load %arg7[%c35, %c0_12] : memref<144x128xbf16, #tpu.memory_space<vmem>>, vector<1x128xbf16>
    tpu.vector_store %arg7[%c35, %c0_12], %0 {strides = array<i32>} : memref<144x128xbf16, #tpu.memory_space<vmem>>, vector<1x128xbf16>,
    %c18_13 = arith.constant 18 : index
    %c0_14 = arith.constant 0 : index
    %11 = vector.load %arg8[%c18_13, %c0_14] : memref<144x128xbf16, #tpu.memory_space<vmem>>, vector<1x128xbf16>
    tpu.vector_store %arg8[%c18_13, %c0_14], %1 {strides = array<i32>} : memref<144x128xbf16, #tpu.memory_space<vmem>>, vector<1x128xbf16>,
    %c35_15 = arith.constant 35 : index
    %c0_16 = arith.constant 0 : index
    %12 = vector.load %arg8[%c35_15, %c0_16] : memref<144x128xbf16, #tpu.memory_space<vmem>>, vector<1x128xbf16>
    tpu.vector_store %arg8[%c35_15, %c0_16], %1 {strides = array<i32>} : memref<144x128xbf16, #tpu.memory_space<vmem>>, vector<1x128xbf16>,
    %c1_17 = arith.constant 1 : index
    %c0_18 = arith.constant 0 : index
    %c0_19 = arith.constant 0 : index
    %13 = vector.load %arg1[%c1_17, %c0_18, %c0_19] : memref<8x16x128xbf16, #tpu.memory_space<vmem>>, vector<1x16x128xbf16>
    %14 = vector.shape_cast %13 : vector<1x16x128xbf16> to vector<16x128xbf16>
    %c19 = arith.constant 19 : index
    %c0_20 = arith.constant 0 : index
    %15 = vector.load %arg7[%c19, %c0_20] : memref<144x128xbf16, #tpu.memory_space<vmem>>, vector<16x128xbf16>
    tpu.vector_store %arg7[%c19, %c0_20], %14 {strides = array<i32>} : memref<144x128xbf16, #tpu.memory_space<vmem>>, vector<16x128xbf16>,
    %c36 = arith.constant 36 : index
    %c0_21 = arith.constant 0 : index
    %16 = vector.load %arg7[%c36, %c0_21] : memref<144x128xbf16, #tpu.memory_space<vmem>>, vector<1x128xbf16>
    tpu.vector_store %arg7[%c36, %c0_21], %0 {strides = array<i32>} : memref<144x128xbf16, #tpu.memory_space<vmem>>, vector<1x128xbf16>,
    %c53 = arith.constant 53 : index
    %c0_22 = arith.constant 0 : index
    %17 = vector.load %arg7[%c53, %c0_22] : memref<144x128xbf16, #tpu.memory_space<vmem>>, vector<1x128xbf16>
    tpu.vector_store %arg7[%c53, %c0_22], %0 {strides = array<i32>} : memref<144x128xbf16, #tpu.memory_space<vmem>>, vector<1x128xbf16>,
    %c36_23 = arith.constant 36 : index
    %c0_24 = arith.constant 0 : index
    %18 = vector.load %arg8[%c36_23, %c0_24] : memref<144x128xbf16, #tpu.memory_space<vmem>>, vector<1x128xbf16>
    tpu.vector_store %arg8[%c36_23, %c0_24], %1 {strides = array<i32>} : memref<144x128xbf16, #tpu.memory_space<vmem>>, vector<1x128xbf16>,
    %c53_25 = arith.constant 53 : index
    %c0_26 = arith.constant 0 : index
    %19 = vector.load %arg8[%c53_25, %c0_26] : memref<144x128xbf16, #tpu.memory_space<vmem>>, vector<1x128xbf16>
    tpu.vector_store %arg8[%c53_25, %c0_26], %1 {strides = array<i32>} : memref<144x128xbf16, #tpu.memory_space<vmem>>, vector<1x128xbf16>,
    %c2 = arith.constant 2 : index
    %c0_27 = arith.constant 0 : index
    %c0_28 = arith.constant 0 : index
    %20 = vector.load %arg1[%c2, %c0_27, %c0_28] : memref<8x16x128xbf16, #tpu.memory_space<vmem>>, vector<1x16x128xbf16>
    %21 = vector.shape_cast %20 : vector<1x16x128xbf16> to vector<16x128xbf16>
    %c37 = arith.constant 37 : index
    %c0_29 = arith.constant 0 : index
    %22 = vector.load %arg7[%c37, %c0_29] : memref<144x128xbf16, #tpu.memory_space<vmem>>, vector<16x128xbf16>
    tpu.vector_store %arg7[%c37, %c0_29], %21 {strides = array<i32>} : memref<144x128xbf16, #tpu.memory_space<vmem>>, vector<16x128xbf16>,
    %c54 = arith.constant 54 : index
    %c0_30 = arith.constant 0 : index
    %23 = vector.load %arg7[%c54, %c0_30] : memref<144x128xbf16, #tpu.memory_space<vmem>>, vector<1x128xbf16>
    tpu.vector_store %arg7[%c54, %c0_30], %0 {strides = array<i32>} : memref<144x128xbf16, #tpu.memory_space<vmem>>, vector<1x128xbf16>,
    %c71 = arith.constant 71 : index
    %c0_31 = arith.constant 0 : index
    %24 = vector.load %arg7[%c71, %c0_31] : memref<144x128xbf16, #tpu.memory_space<vmem>>, vector<1x128xbf16>
    tpu.vector_store %arg7[%c71, %c0_31], %0 {strides = array<i32>} : memref<144x128xbf16, #tpu.memory_space<vmem>>, vector<1x128xbf16>,
    %c54_32 = arith.constant 54 : index
    %c0_33 = arith.constant 0 : index
    %25 = vector.load %arg8[%c54_32, %c0_33] : memref<144x128xbf16, #tpu.memory_space<vmem>>, vector<1x128xbf16>
    tpu.vector_store %arg8[%c54_32, %c0_33], %1 {strides = array<i32>} : memref<144x128xbf16, #tpu.memory_space<vmem>>, vector<1x128xbf16>,
    %c71_34 = arith.constant 71 : index
    %c0_35 = arith.constant 0 : index
    %26 = vector.load %arg8[%c71_34, %c0_35] : memref<144x128xbf16, #tpu.memory_space<vmem>>, vector<1x128xbf16>
    tpu.vector_store %arg8[%c71_34, %c0_35], %1 {strides = array<i32>} : memref<144x128xbf16, #tpu.memory_space<vmem>>, vector<1x128xbf16>,
    %c3 = arith.constant 3 : index
    %c0_36 = arith.constant 0 : index
    %c0_37 = arith.constant 0 : index
    %27 = vector.load %arg1[%c3, %c0_36, %c0_37] : memref<8x16x128xbf16, #tpu.memory_space<vmem>>, vector<1x16x128xbf16>
    %28 = vector.shape_cast %27 : vector<1x16x128xbf16> to vector<16x128xbf16>
    %c55 = arith.constant 55 : index
    %c0_38 = arith.constant 0 : index
    %29 = vector.load %arg7[%c55, %c0_38] : memref<144x128xbf16, #tpu.memory_space<vmem>>, vector<16x128xbf16>
    tpu.vector_store %arg7[%c55, %c0_38], %28 {strides = array<i32>} : memref<144x128xbf16, #tpu.memory_space<vmem>>, vector<16x128xbf16>,
    %c72 = arith.constant 72 : index
    %c0_39 = arith.constant 0 : index
    %30 = vector.load %arg7[%c72, %c0_39] : memref<144x128xbf16, #tpu.memory_space<vmem>>, vector<1x128xbf16>
    tpu.vector_store %arg7[%c72, %c0_39], %0 {strides = array<i32>} : memref<144x128xbf16, #tpu.memory_space<vmem>>, vector<1x128xbf16>,
    %c89 = arith.constant 89 : index
    %c0_40 = arith.constant 0 : index
    %31 = vector.load %arg7[%c89, %c0_40] : memref<144x128xbf16, #tpu.memory_space<vmem>>, vector<1x128xbf16>
    tpu.vector_store %arg7[%c89, %c0_40], %0 {strides = array<i32>} : memref<144x128xbf16, #tpu.memory_space<vmem>>, vector<1x128xbf16>,
    %c72_41 = arith.constant 72 : index
    %c0_42 = arith.constant 0 : index
    %32 = vector.load %arg8[%c72_41, %c0_42] : memref<144x128xbf16, #tpu.memory_space<vmem>>, vector<1x128xbf16>
    tpu.vector_store %arg8[%c72_41, %c0_42], %1 {strides = array<i32>} : memref<144x128xbf16, #tpu.memory_space<vmem>>, vector<1x128xbf16>,
    %c89_43 = arith.constant 89 : index
    %c0_44 = arith.constant 0 : index
    %33 = vector.load %arg8[%c89_43, %c0_44] : memref<144x128xbf16, #tpu.memory_space<vmem>>, vector<1x128xbf16>
    tpu.vector_store %arg8[%c89_43, %c0_44], %1 {strides = array<i32>} : memref<144x128xbf16, #tpu.memory_space<vmem>>, vector<1x128xbf16>,
    %c4 = arith.constant 4 : index
    %c0_45 = arith.constant 0 : index
    %c0_46 = arith.constant 0 : index
    %34 = vector.load %arg1[%c4, %c0_45, %c0_46] : memref<8x16x128xbf16, #tpu.memory_space<vmem>>, vector<1x16x128xbf16>
    %35 = vector.shape_cast %34 : vector<1x16x128xbf16> to vector<16x128xbf16>
    %c73 = arith.constant 73 : index
    %c0_47 = arith.constant 0 : index
    %36 = vector.load %arg7[%c73, %c0_47] : memref<144x128xbf16, #tpu.memory_space<vmem>>, vector<16x128xbf16>
    tpu.vector_store %arg7[%c73, %c0_47], %35 {strides = array<i32>} : memref<144x128xbf16, #tpu.memory_space<vmem>>, vector<16x128xbf16>,
    %c90 = arith.constant 90 : index
    %c0_48 = arith.constant 0 : index
    %37 = vector.load %arg7[%c90, %c0_48] : memref<144x128xbf16, #tpu.memory_space<vmem>>, vector<1x128xbf16>
    tpu.vector_store %arg7[%c90, %c0_48], %0 {strides = array<i32>} : memref<144x128xbf16, #tpu.memory_space<vmem>>, vector<1x128xbf16>,
    %c107 = arith.constant 107 : index
    %c0_49 = arith.constant 0 : index
    %38 = vector.load %arg7[%c107, %c0_49] : memref<144x128xbf16, #tpu.memory_space<vmem>>, vector<1x128xbf16>
    tpu.vector_store %arg7[%c107, %c0_49], %0 {strides = array<i32>} : memref<144x128xbf16, #tpu.memory_space<vmem>>, vector<1x128xbf16>,
    %c90_50 = arith.constant 90 : index
    %c0_51 = arith.constant 0 : index
    %39 = vector.load %arg8[%c90_50, %c0_51] : memref<144x128xbf16, #tpu.memory_space<vmem>>, vector<1x128xbf16>
    tpu.vector_store %arg8[%c90_50, %c0_51], %1 {strides = array<i32>} : memref<144x128xbf16, #tpu.memory_space<vmem>>, vector<1x128xbf16>,
    %c107_52 = arith.constant 107 : index
    %c0_53 = arith.constant 0 : index
    %40 = vector.load %arg8[%c107_52, %c0_53] : memref<144x128xbf16, #tpu.memory_space<vmem>>, vector<1x128xbf16>
    tpu.vector_store %arg8[%c107_52, %c0_53], %1 {strides = array<i32>} : memref<144x128xbf16, #tpu.memory_space<vmem>>, vector<1x128xbf16>,
    %c5 = arith.constant 5 : index
    %c0_54 = arith.constant 0 : index
    %c0_55 = arith.constant 0 : index
    %41 = vector.load %arg1[%c5, %c0_54, %c0_55] : memref<8x16x128xbf16, #tpu.memory_space<vmem>>, vector<1x16x128xbf16>
    %42 = vector.shape_cast %41 : vector<1x16x128xbf16> to vector<16x128xbf16>
    %c91 = arith.constant 91 : index
    %c0_56 = arith.constant 0 : index
    %43 = vector.load %arg7[%c91, %c0_56] : memref<144x128xbf16, #tpu.memory_space<vmem>>, vector<16x128xbf16>
    tpu.vector_store %arg7[%c91, %c0_56], %42 {strides = array<i32>} : memref<144x128xbf16, #tpu.memory_space<vmem>>, vector<16x128xbf16>,
    %c108 = arith.constant 108 : index
    %c0_57 = arith.constant 0 : index
    %44 = vector.load %arg7[%c108, %c0_57] : memref<144x128xbf16, #tpu.memory_space<vmem>>, vector<1x128xbf16>
    tpu.vector_store %arg7[%c108, %c0_57], %0 {strides = array<i32>} : memref<144x128xbf16, #tpu.memory_space<vmem>>, vector<1x128xbf16>,
    %c125 = arith.constant 125 : index
    %c0_58 = arith.constant 0 : index
    %45 = vector.load %arg7[%c125, %c0_58] : memref<144x128xbf16, #tpu.memory_space<vmem>>, vector<1x128xbf16>
    tpu.vector_store %arg7[%c125, %c0_58], %0 {strides = array<i32>} : memref<144x128xbf16, #tpu.memory_space<vmem>>, vector<1x128xbf16>,
    %c108_59 = arith.constant 108 : index
    %c0_60 = arith.constant 0 : index
    %46 = vector.load %arg8[%c108_59, %c0_60] : memref<144x128xbf16, #tpu.memory_space<vmem>>, vector<1x128xbf16>
    tpu.vector_store %arg8[%c108_59, %c0_60], %1 {strides = array<i32>} : memref<144x128xbf16, #tpu.memory_space<vmem>>, vector<1x128xbf16>,
    %c125_61 = arith.constant 125 : index
    %c0_62 = arith.constant 0 : index
    %47 = vector.load %arg8[%c125_61, %c0_62] : memref<144x128xbf16, #tpu.memory_space<vmem>>, vector<1x128xbf16>
    tpu.vector_store %arg8[%c125_61, %c0_62], %1 {strides = array<i32>} : memref<144x128xbf16, #tpu.memory_space<vmem>>, vector<1x128xbf16>,
    %c6 = arith.constant 6 : index
    %c0_63 = arith.constant 0 : index
    %c0_64 = arith.constant 0 : index
    %48 = vector.load %arg1[%c6, %c0_63, %c0_64] : memref<8x16x128xbf16, #tpu.memory_space<vmem>>, vector<1x16x128xbf16>
    %49 = vector.shape_cast %48 : vector<1x16x128xbf16> to vector<16x128xbf16>
    %c109 = arith.constant 109 : index
    %c0_65 = arith.constant 0 : index
    %50 = vector.load %arg7[%c109, %c0_65] : memref<144x128xbf16, #tpu.memory_space<vmem>>, vector<16x128xbf16>
    tpu.vector_store %arg7[%c109, %c0_65], %49 {strides = array<i32>} : memref<144x128xbf16, #tpu.memory_space<vmem>>, vector<16x128xbf16>,
    %c126 = arith.constant 126 : index
    %c0_66 = arith.constant 0 : index
    %51 = vector.load %arg7[%c126, %c0_66] : memref<144x128xbf16, #tpu.memory_space<vmem>>, vector<1x128xbf16>
    tpu.vector_store %arg7[%c126, %c0_66], %0 {strides = array<i32>} : memref<144x128xbf16, #tpu.memory_space<vmem>>, vector<1x128xbf16>,
    %c143 = arith.constant 143 : index
    %c0_67 = arith.constant 0 : index
    %52 = vector.load %arg7[%c143, %c0_67] : memref<144x128xbf16, #tpu.memory_space<vmem>>, vector<1x128xbf16>
    tpu.vector_store %arg7[%c143, %c0_67], %0 {strides = array<i32>} : memref<144x128xbf16, #tpu.memory_space<vmem>>, vector<1x128xbf16>,
    %c126_68 = arith.constant 126 : index
    %c0_69 = arith.constant 0 : index
    %53 = vector.load %arg8[%c126_68, %c0_69] : memref<144x128xbf16, #tpu.memory_space<vmem>>, vector<1x128xbf16>
    tpu.vector_store %arg8[%c126_68, %c0_69], %1 {strides = array<i32>} : memref<144x128xbf16, #tpu.memory_space<vmem>>, vector<1x128xbf16>,
    %c143_70 = arith.constant 143 : index
    %c0_71 = arith.constant 0 : index
    %54 = vector.load %arg8[%c143_70, %c0_71] : memref<144x128xbf16, #tpu.memory_space<vmem>>, vector<1x128xbf16>
    tpu.vector_store %arg8[%c143_70, %c0_71], %1 {strides = array<i32>} : memref<144x128xbf16, #tpu.memory_space<vmem>>, vector<1x128xbf16>,
    %c7 = arith.constant 7 : index
    %c0_72 = arith.constant 0 : index
    %c0_73 = arith.constant 0 : index
    %55 = vector.load %arg1[%c7, %c0_72, %c0_73] : memref<8x16x128xbf16, #tpu.memory_space<vmem>>, vector<1x16x128xbf16>
    %56 = vector.shape_cast %55 : vector<1x16x128xbf16> to vector<16x128xbf16>
    %c127 = arith.constant 127 : index
    %c0_74 = arith.constant 0 : index
    %57 = vector.load %arg7[%c127, %c0_74] : memref<144x128xbf16, #tpu.memory_space<vmem>>, vector<16x128xbf16>
    tpu.vector_store %arg7[%c127, %c0_74], %56 {strides = array<i32>} : memref<144x128xbf16, #tpu.memory_space<vmem>>, vector<16x128xbf16>,
    %cst_75 = arith.constant 0.000000e+00 : f32
    %58 = vector.broadcast %cst_75 : f32 to vector<142x128xf32>
    %c0_76 = arith.constant 0 : index
    %c0_77 = arith.constant 0 : index
    %59 = vector.load %arg7[%c0_76, %c0_77] : memref<144x128xbf16, #tpu.memory_space<vmem>>, vector<142x128xbf16>
    %c0_78 = arith.constant 0 : index
    %c0_79 = arith.constant 0 : index
    %c0_80 = arith.constant 0 : index
    %60 = vector.load %arg2[%c0_78, %c0_79, %c0_80] : memref<3x128x128xbf16, #tpu.memory_space<vmem>>, vector<1x128x128xbf16>
    %61 = vector.shape_cast %60 : vector<1x128x128xbf16> to vector<128x128xbf16>
    %cst_81 = arith.constant dense<0.000000e+00> : vector<142x128xf32>
    %62 = tpu.matmul %59, %61, %cst_81 {dimension_numbers = #tpu.dot_dimension_numbers<[1], [0], [0], [1], [0, 0, 1, 1], [], []>} : vector<142x128xbf16>, vector<128x128xbf16>, vector<142x128xf32> -> vector<142x128xf32>
    %63 = arith.addf %58, %62 : vector<142x128xf32>
    %c1_82 = arith.constant 1 : index
    %c0_83 = arith.constant 0 : index
    %64 = vector.load %arg7[%c1_82, %c0_83] : memref<144x128xbf16, #tpu.memory_space<vmem>>, vector<142x128xbf16>
    %c1_84 = arith.constant 1 : index
    %c0_85 = arith.constant 0 : index
    %c0_86 = arith.constant 0 : index
    %65 = vector.load %arg2[%c1_84, %c0_85, %c0_86] : memref<3x128x128xbf16, #tpu.memory_space<vmem>>, vector<1x128x128xbf16>
    %66 = vector.shape_cast %65 : vector<1x128x128xbf16> to vector<128x128xbf16>
    %cst_87 = arith.constant dense<0.000000e+00> : vector<142x128xf32>
    %67 = tpu.matmul %64, %66, %cst_87 {dimension_numbers = #tpu.dot_dimension_numbers<[1], [0], [0], [1], [0, 0, 1, 1], [], []>} : vector<142x128xbf16>, vector<128x128xbf16>, vector<142x128xf32> -> vector<142x128xf32>
    %68 = arith.addf %63, %67 : vector<142x128xf32>
    %c2_88 = arith.constant 2 : index
    %c0_89 = arith.constant 0 : index
    %69 = vector.load %arg7[%c2_88, %c0_89] : memref<144x128xbf16, #tpu.memory_space<vmem>>, vector<142x128xbf16>
    %c2_90 = arith.constant 2 : index
    %c0_91 = arith.constant 0 : index
    %c0_92 = arith.constant 0 : index
    %70 = vector.load %arg2[%c2_90, %c0_91, %c0_92] : memref<3x128x128xbf16, #tpu.memory_space<vmem>>, vector<1x128x128xbf16>
    %71 = vector.shape_cast %70 : vector<1x128x128xbf16> to vector<128x128xbf16>
    %cst_93 = arith.constant dense<0.000000e+00> : vector<142x128xf32>
    %72 = tpu.matmul %69, %71, %cst_93 {dimension_numbers = #tpu.dot_dimension_numbers<[1], [0], [0], [1], [0, 0, 1, 1], [], []>} : vector<142x128xbf16>, vector<128x128xbf16>, vector<142x128xf32> -> vector<142x128xf32>
    %73 = arith.addf %68, %72 : vector<142x128xf32>
    %c0_94 = arith.constant 0 : index
    %c0_95 = arith.constant 0 : index
    %74 = vector.load %arg3[%c0_94, %c0_95] : memref<1x128xf32, #tpu.memory_space<vmem>>, vector<1x128xf32>
    %75 = vector.broadcast %74 : vector<1x128xf32> to vector<142x128xf32>
    %76 = arith.addf %73, %75 : vector<142x128xf32>
    %cst_96 = arith.constant 0.000000e+00 : f32
    %77 = vector.broadcast %cst_96 : f32 to vector<142x128xf32>
    %78 = arith.maximumf %76, %77 : vector<142x128xf32>
    %79 = arith.truncf %78 : vector<142x128xf32> to vector<142x128xbf16>
    %80 = vector.extract_strided_slice %79 {offsets = [0, 0], sizes = [16, 128], strides = [1, 1]} : vector<142x128xbf16> to vector<16x128xbf16>
    %c1_97 = arith.constant 1 : index
    %c0_98 = arith.constant 0 : index
    %81 = vector.load %arg8[%c1_97, %c0_98] : memref<144x128xbf16, #tpu.memory_space<vmem>>, vector<16x128xbf16>
    tpu.vector_store %arg8[%c1_97, %c0_98], %80 {strides = array<i32>} : memref<144x128xbf16, #tpu.memory_space<vmem>>, vector<16x128xbf16>,
    %82 = vector.extract_strided_slice %79 {offsets = [18, 0], sizes = [16, 128], strides = [1, 1]} : vector<142x128xbf16> to vector<16x128xbf16>
    %c19_99 = arith.constant 19 : index
    %c0_100 = arith.constant 0 : index
    %83 = vector.load %arg8[%c19_99, %c0_100] : memref<144x128xbf16, #tpu.memory_space<vmem>>, vector<16x128xbf16>
    tpu.vector_store %arg8[%c19_99, %c0_100], %82 {strides = array<i32>} : memref<144x128xbf16, #tpu.memory_space<vmem>>, vector<16x128xbf16>,
    %84 = vector.extract_strided_slice %79 {offsets = [36, 0], sizes = [16, 128], strides = [1, 1]} : vector<142x128xbf16> to vector<16x128xbf16>
    %c37_101 = arith.constant 37 : index
    %c0_102 = arith.constant 0 : index
    %85 = vector.load %arg8[%c37_101, %c0_102] : memref<144x128xbf16, #tpu.memory_space<vmem>>, vector<16x128xbf16>
    tpu.vector_store %arg8[%c37_101, %c0_102], %84 {strides = array<i32>} : memref<144x128xbf16, #tpu.memory_space<vmem>>, vector<16x128xbf16>,
    %86 = vector.extract_strided_slice %79 {offsets = [54, 0], sizes = [16, 128], strides = [1, 1]} : vector<142x128xbf16> to vector<16x128xbf16>
    %c55_103 = arith.constant 55 : index
    %c0_104 = arith.constant 0 : index
    %87 = vector.load %arg8[%c55_103, %c0_104] : memref<144x128xbf16, #tpu.memory_space<vmem>>, vector<16x128xbf16>
    tpu.vector_store %arg8[%c55_103, %c0_104], %86 {strides = array<i32>} : memref<144x128xbf16, #tpu.memory_space<vmem>>, vector<16x128xbf16>,
    %88 = vector.extract_strided_slice %79 {offsets = [72, 0], sizes = [16, 128], strides = [1, 1]} : vector<142x128xbf16> to vector<16x128xbf16>
    %c73_105 = arith.constant 73 : index
    %c0_106 = arith.constant 0 : index
    %89 = vector.load %arg8[%c73_105, %c0_106] : memref<144x128xbf16, #tpu.memory_space<vmem>>, vector<16x128xbf16>
    tpu.vector_store %arg8[%c73_105, %c0_106], %88 {strides = array<i32>} : memref<144x128xbf16, #tpu.memory_space<vmem>>, vector<16x128xbf16>,
    %90 = vector.extract_strided_slice %79 {offsets = [90, 0], sizes = [16, 128], strides = [1, 1]} : vector<142x128xbf16> to vector<16x128xbf16>
    %c91_107 = arith.constant 91 : index
    %c0_108 = arith.constant 0 : index
    %91 = vector.load %arg8[%c91_107, %c0_108] : memref<144x128xbf16, #tpu.memory_space<vmem>>, vector<16x128xbf16>
    tpu.vector_store %arg8[%c91_107, %c0_108], %90 {strides = array<i32>} : memref<144x128xbf16, #tpu.memory_space<vmem>>, vector<16x128xbf16>,
    %92 = vector.extract_strided_slice %79 {offsets = [108, 0], sizes = [16, 128], strides = [1, 1]} : vector<142x128xbf16> to vector<16x128xbf16>
    %c109_109 = arith.constant 109 : index
    %c0_110 = arith.constant 0 : index
    %93 = vector.load %arg8[%c109_109, %c0_110] : memref<144x128xbf16, #tpu.memory_space<vmem>>, vector<16x128xbf16>
    tpu.vector_store %arg8[%c109_109, %c0_110], %92 {strides = array<i32>} : memref<144x128xbf16, #tpu.memory_space<vmem>>, vector<16x128xbf16>,
    %94 = vector.extract_strided_slice %79 {offsets = [126, 0], sizes = [16, 128], strides = [1, 1]} : vector<142x128xbf16> to vector<16x128xbf16>
    %c127_111 = arith.constant 127 : index
    %c0_112 = arith.constant 0 : index
    %95 = vector.load %arg8[%c127_111, %c0_112] : memref<144x128xbf16, #tpu.memory_space<vmem>>, vector<16x128xbf16>
    tpu.vector_store %arg8[%c127_111, %c0_112], %94 {strides = array<i32>} : memref<144x128xbf16, #tpu.memory_space<vmem>>, vector<16x128xbf16>,
    %cst_113 = arith.constant 0.000000e+00 : f32
    %96 = vector.broadcast %cst_113 : f32 to vector<142x128xf32>
    %c0_114 = arith.constant 0 : index
    %c0_115 = arith.constant 0 : index
    %97 = vector.load %arg8[%c0_114, %c0_115] : memref<144x128xbf16, #tpu.memory_space<vmem>>, vector<142x128xbf16>
    %c0_116 = arith.constant 0 : index
    %c0_117 = arith.constant 0 : index
    %c0_118 = arith.constant 0 : index
    %98 = vector.load %arg4[%c0_116, %c0_117, %c0_118] : memref<3x128x128xbf16, #tpu.memory_space<vmem>>, vector<1x128x128xbf16>
    %99 = vector.shape_cast %98 : vector<1x128x128xbf16> to vector<128x128xbf16>
    %cst_119 = arith.constant dense<0.000000e+00> : vector<142x128xf32>
    %100 = tpu.matmul %97, %99, %cst_119 {dimension_numbers = #tpu.dot_dimension_numbers<[1], [0], [0], [1], [0, 0, 1, 1], [], []>} : vector<142x128xbf16>, vector<128x128xbf16>, vector<142x128xf32> -> vector<142x128xf32>
    %101 = arith.addf %96, %100 : vector<142x128xf32>
    %c1_120 = arith.constant 1 : index
    %c0_121 = arith.constant 0 : index
    %102 = vector.load %arg8[%c1_120, %c0_121] : memref<144x128xbf16, #tpu.memory_space<vmem>>, vector<142x128xbf16>
    %c1_122 = arith.constant 1 : index
    %c0_123 = arith.constant 0 : index
    %c0_124 = arith.constant 0 : index
    %103 = vector.load %arg4[%c1_122, %c0_123, %c0_124] : memref<3x128x128xbf16, #tpu.memory_space<vmem>>, vector<1x128x128xbf16>
    %104 = vector.shape_cast %103 : vector<1x128x128xbf16> to vector<128x128xbf16>
    %cst_125 = arith.constant dense<0.000000e+00> : vector<142x128xf32>
    %105 = tpu.matmul %102, %104, %cst_125 {dimension_numbers = #tpu.dot_dimension_numbers<[1], [0], [0], [1], [0, 0, 1, 1], [], []>} : vector<142x128xbf16>, vector<128x128xbf16>, vector<142x128xf32> -> vector<142x128xf32>
    %106 = arith.addf %101, %105 : vector<142x128xf32>
    %c2_126 = arith.constant 2 : index
    %c0_127 = arith.constant 0 : index
    %107 = vector.load %arg8[%c2_126, %c0_127] : memref<144x128xbf16, #tpu.memory_space<vmem>>, vector<142x128xbf16>
    %c2_128 = arith.constant 2 : index
    %c0_129 = arith.constant 0 : index
    %c0_130 = arith.constant 0 : index
    %108 = vector.load %arg4[%c2_128, %c0_129, %c0_130] : memref<3x128x128xbf16, #tpu.memory_space<vmem>>, vector<1x128x128xbf16>
    %109 = vector.shape_cast %108 : vector<1x128x128xbf16> to vector<128x128xbf16>
    %cst_131 = arith.constant dense<0.000000e+00> : vector<142x128xf32>
    %110 = tpu.matmul %107, %109, %cst_131 {dimension_numbers = #tpu.dot_dimension_numbers<[1], [0], [0], [1], [0, 0, 1, 1], [], []>} : vector<142x128xbf16>, vector<128x128xbf16>, vector<142x128xf32> -> vector<142x128xf32>
    %111 = arith.addf %106, %110 : vector<142x128xf32>
    %c0_132 = arith.constant 0 : index
    %c0_133 = arith.constant 0 : index
    %112 = vector.load %arg5[%c0_132, %c0_133] : memref<1x128xf32, #tpu.memory_space<vmem>>, vector<1x128xf32>
    %113 = vector.broadcast %112 : vector<1x128xf32> to vector<142x128xf32>
    %114 = arith.addf %111, %113 : vector<142x128xf32>
    %c0_134 = arith.constant 0 : index
    %c0_135 = arith.constant 0 : index
    %c0_136 = arith.constant 0 : index
    %115 = vector.load %arg1[%c0_134, %c0_135, %c0_136] : memref<8x16x128xbf16, #tpu.memory_space<vmem>>, vector<1x16x128xbf16>
    %116 = vector.shape_cast %115 : vector<1x16x128xbf16> to vector<16x128xbf16>
    %117 = arith.extf %116 : vector<16x128xbf16> to vector<16x128xf32>
    %118 = vector.extract_strided_slice %114 {offsets = [0, 0], sizes = [16, 128], strides = [1, 1]} : vector<142x128xf32> to vector<16x128xf32>
    %119 = arith.addf %118, %117 : vector<16x128xf32>
    %cst_137 = arith.constant 0.000000e+00 : f32
    %120 = vector.broadcast %cst_137 : f32 to vector<16x128xf32>
    %121 = arith.maximumf %119, %120 : vector<16x128xf32>
    %c0_138 = arith.constant 0 : index
    %c0_139 = arith.constant 0 : index
    %c0_140 = arith.constant 0 : index
    %122 = vector.load %arg6[%c0_138, %c0_139, %c0_140] : memref<8x16x128xf32, #tpu.memory_space<vmem>>, vector<1x16x128xf32>
    %123 = vector.shape_cast %122 : vector<1x16x128xf32> to vector<16x128xf32>
    %124 = vector.shape_cast %121 : vector<16x128xf32> to vector<1x16x128xf32>
    tpu.vector_store %arg6[%c0_138, %c0_139, %c0_140], %124 {strides = array<i32>} : memref<8x16x128xf32, #tpu.memory_space<vmem>>, vector<1x16x128xf32>,
    %c1_141 = arith.constant 1 : index
    %c0_142 = arith.constant 0 : index
    %c0_143 = arith.constant 0 : index
    %125 = vector.load %arg1[%c1_141, %c0_142, %c0_143] : memref<8x16x128xbf16, #tpu.memory_space<vmem>>, vector<1x16x128xbf16>
    %126 = vector.shape_cast %125 : vector<1x16x128xbf16> to vector<16x128xbf16>
    %127 = arith.extf %126 : vector<16x128xbf16> to vector<16x128xf32>
    %128 = vector.extract_strided_slice %114 {offsets = [18, 0], sizes = [16, 128], strides = [1, 1]} : vector<142x128xf32> to vector<16x128xf32>
    %129 = arith.addf %128, %127 : vector<16x128xf32>
    %cst_144 = arith.constant 0.000000e+00 : f32
    %130 = vector.broadcast %cst_144 : f32 to vector<16x128xf32>
    %131 = arith.maximumf %129, %130 : vector<16x128xf32>
    %c1_145 = arith.constant 1 : index
    %c0_146 = arith.constant 0 : index
    %c0_147 = arith.constant 0 : index
    %132 = vector.load %arg6[%c1_145, %c0_146, %c0_147] : memref<8x16x128xf32, #tpu.memory_space<vmem>>, vector<1x16x128xf32>
    %133 = vector.shape_cast %132 : vector<1x16x128xf32> to vector<16x128xf32>
    %134 = vector.shape_cast %131 : vector<16x128xf32> to vector<1x16x128xf32>
    tpu.vector_store %arg6[%c1_145, %c0_146, %c0_147], %134 {strides = array<i32>} : memref<8x16x128xf32, #tpu.memory_space<vmem>>, vector<1x16x128xf32>,
    %c2_148 = arith.constant 2 : index
    %c0_149 = arith.constant 0 : index
    %c0_150 = arith.constant 0 : index
    %135 = vector.load %arg1[%c2_148, %c0_149, %c0_150] : memref<8x16x128xbf16, #tpu.memory_space<vmem>>, vector<1x16x128xbf16>
    %136 = vector.shape_cast %135 : vector<1x16x128xbf16> to vector<16x128xbf16>
    %137 = arith.extf %136 : vector<16x128xbf16> to vector<16x128xf32>
    %138 = vector.extract_strided_slice %114 {offsets = [36, 0], sizes = [16, 128], strides = [1, 1]} : vector<142x128xf32> to vector<16x128xf32>
    %139 = arith.addf %138, %137 : vector<16x128xf32>
    %cst_151 = arith.constant 0.000000e+00 : f32
    %140 = vector.broadcast %cst_151 : f32 to vector<16x128xf32>
    %141 = arith.maximumf %139, %140 : vector<16x128xf32>
    %c2_152 = arith.constant 2 : index
    %c0_153 = arith.constant 0 : index
    %c0_154 = arith.constant 0 : index
    %142 = vector.load %arg6[%c2_152, %c0_153, %c0_154] : memref<8x16x128xf32, #tpu.memory_space<vmem>>, vector<1x16x128xf32>
    %143 = vector.shape_cast %142 : vector<1x16x128xf32> to vector<16x128xf32>
    %144 = vector.shape_cast %141 : vector<16x128xf32> to vector<1x16x128xf32>
    tpu.vector_store %arg6[%c2_152, %c0_153, %c0_154], %144 {strides = array<i32>} : memref<8x16x128xf32, #tpu.memory_space<vmem>>, vector<1x16x128xf32>,
    %c3_155 = arith.constant 3 : index
    %c0_156 = arith.constant 0 : index
    %c0_157 = arith.constant 0 : index
    %145 = vector.load %arg1[%c3_155, %c0_156, %c0_157] : memref<8x16x128xbf16, #tpu.memory_space<vmem>>, vector<1x16x128xbf16>
    %146 = vector.shape_cast %145 : vector<1x16x128xbf16> to vector<16x128xbf16>
    %147 = arith.extf %146 : vector<16x128xbf16> to vector<16x128xf32>
    %148 = vector.extract_strided_slice %114 {offsets = [54, 0], sizes = [16, 128], strides = [1, 1]} : vector<142x128xf32> to vector<16x128xf32>
    %149 = arith.addf %148, %147 : vector<16x128xf32>
    %cst_158 = arith.constant 0.000000e+00 : f32
    %150 = vector.broadcast %cst_158 : f32 to vector<16x128xf32>
    %151 = arith.maximumf %149, %150 : vector<16x128xf32>
    %c3_159 = arith.constant 3 : index
    %c0_160 = arith.constant 0 : index
    %c0_161 = arith.constant 0 : index
    %152 = vector.load %arg6[%c3_159, %c0_160, %c0_161] : memref<8x16x128xf32, #tpu.memory_space<vmem>>, vector<1x16x128xf32>
    %153 = vector.shape_cast %152 : vector<1x16x128xf32> to vector<16x128xf32>
    %154 = vector.shape_cast %151 : vector<16x128xf32> to vector<1x16x128xf32>
    tpu.vector_store %arg6[%c3_159, %c0_160, %c0_161], %154 {strides = array<i32>} : memref<8x16x128xf32, #tpu.memory_space<vmem>>, vector<1x16x128xf32>,
    %c4_162 = arith.constant 4 : index
    %c0_163 = arith.constant 0 : index
    %c0_164 = arith.constant 0 : index
    %155 = vector.load %arg1[%c4_162, %c0_163, %c0_164] : memref<8x16x128xbf16, #tpu.memory_space<vmem>>, vector<1x16x128xbf16>
    %156 = vector.shape_cast %155 : vector<1x16x128xbf16> to vector<16x128xbf16>
    %157 = arith.extf %156 : vector<16x128xbf16> to vector<16x128xf32>
    %158 = vector.extract_strided_slice %114 {offsets = [72, 0], sizes = [16, 128], strides = [1, 1]} : vector<142x128xf32> to vector<16x128xf32>
    %159 = arith.addf %158, %157 : vector<16x128xf32>
    %cst_165 = arith.constant 0.000000e+00 : f32
    %160 = vector.broadcast %cst_165 : f32 to vector<16x128xf32>
    %161 = arith.maximumf %159, %160 : vector<16x128xf32>
    %c4_166 = arith.constant 4 : index
    %c0_167 = arith.constant 0 : index
    %c0_168 = arith.constant 0 : index
    %162 = vector.load %arg6[%c4_166, %c0_167, %c0_168] : memref<8x16x128xf32, #tpu.memory_space<vmem>>, vector<1x16x128xf32>
    %163 = vector.shape_cast %162 : vector<1x16x128xf32> to vector<16x128xf32>
    %164 = vector.shape_cast %161 : vector<16x128xf32> to vector<1x16x128xf32>
    tpu.vector_store %arg6[%c4_166, %c0_167, %c0_168], %164 {strides = array<i32>} : memref<8x16x128xf32, #tpu.memory_space<vmem>>, vector<1x16x128xf32>,
    %c5_169 = arith.constant 5 : index
    %c0_170 = arith.constant 0 : index
    %c0_171 = arith.constant 0 : index
    %165 = vector.load %arg1[%c5_169, %c0_170, %c0_171] : memref<8x16x128xbf16, #tpu.memory_space<vmem>>, vector<1x16x128xbf16>
    %166 = vector.shape_cast %165 : vector<1x16x128xbf16> to vector<16x128xbf16>
    %167 = arith.extf %166 : vector<16x128xbf16> to vector<16x128xf32>
    %168 = vector.extract_strided_slice %114 {offsets = [90, 0], sizes = [16, 128], strides = [1, 1]} : vector<142x128xf32> to vector<16x128xf32>
    %169 = arith.addf %168, %167 : vector<16x128xf32>
    %cst_172 = arith.constant 0.000000e+00 : f32
    %170 = vector.broadcast %cst_172 : f32 to vector<16x128xf32>
    %171 = arith.maximumf %169, %170 : vector<16x128xf32>
    %c5_173 = arith.constant 5 : index
    %c0_174 = arith.constant 0 : index
    %c0_175 = arith.constant 0 : index
    %172 = vector.load %arg6[%c5_173, %c0_174, %c0_175] : memref<8x16x128xf32, #tpu.memory_space<vmem>>, vector<1x16x128xf32>
    %173 = vector.shape_cast %172 : vector<1x16x128xf32> to vector<16x128xf32>
    %174 = vector.shape_cast %171 : vector<16x128xf32> to vector<1x16x128xf32>
    tpu.vector_store %arg6[%c5_173, %c0_174, %c0_175], %174 {strides = array<i32>} : memref<8x16x128xf32, #tpu.memory_space<vmem>>, vector<1x16x128xf32>,
    %c6_176 = arith.constant 6 : index
    %c0_177 = arith.constant 0 : index
    %c0_178 = arith.constant 0 : index
    %175 = vector.load %arg1[%c6_176, %c0_177, %c0_178] : memref<8x16x128xbf16, #tpu.memory_space<vmem>>, vector<1x16x128xbf16>
    %176 = vector.shape_cast %175 : vector<1x16x128xbf16> to vector<16x128xbf16>
    %177 = arith.extf %176 : vector<16x128xbf16> to vector<16x128xf32>
    %178 = vector.extract_strided_slice %114 {offsets = [108, 0], sizes = [16, 128], strides = [1, 1]} : vector<142x128xf32> to vector<16x128xf32>
    %179 = arith.addf %178, %177 : vector<16x128xf32>
    %cst_179 = arith.constant 0.000000e+00 : f32
    %180 = vector.broadcast %cst_179 : f32 to vector<16x128xf32>
    %181 = arith.maximumf %179, %180 : vector<16x128xf32>
    %c6_180 = arith.constant 6 : index
    %c0_181 = arith.constant 0 : index
    %c0_182 = arith.constant 0 : index
    %182 = vector.load %arg6[%c6_180, %c0_181, %c0_182] : memref<8x16x128xf32, #tpu.memory_space<vmem>>, vector<1x16x128xf32>
    %183 = vector.shape_cast %182 : vector<1x16x128xf32> to vector<16x128xf32>
    %184 = vector.shape_cast %181 : vector<16x128xf32> to vector<1x16x128xf32>
    tpu.vector_store %arg6[%c6_180, %c0_181, %c0_182], %184 {strides = array<i32>} : memref<8x16x128xf32, #tpu.memory_space<vmem>>, vector<1x16x128xf32>,
    %c7_183 = arith.constant 7 : index
    %c0_184 = arith.constant 0 : index
    %c0_185 = arith.constant 0 : index
    %185 = vector.load %arg1[%c7_183, %c0_184, %c0_185] : memref<8x16x128xbf16, #tpu.memory_space<vmem>>, vector<1x16x128xbf16>
    %186 = vector.shape_cast %185 : vector<1x16x128xbf16> to vector<16x128xbf16>
    %187 = arith.extf %186 : vector<16x128xbf16> to vector<16x128xf32>
    %188 = vector.extract_strided_slice %114 {offsets = [126, 0], sizes = [16, 128], strides = [1, 1]} : vector<142x128xf32> to vector<16x128xf32>
    %189 = arith.addf %188, %187 : vector<16x128xf32>
    %cst_186 = arith.constant 0.000000e+00 : f32
    %190 = vector.broadcast %cst_186 : f32 to vector<16x128xf32>
    %191 = arith.maximumf %189, %190 : vector<16x128xf32>
    %c7_187 = arith.constant 7 : index
    %c0_188 = arith.constant 0 : index
    %c0_189 = arith.constant 0 : index
    %192 = vector.load %arg6[%c7_187, %c0_188, %c0_189] : memref<8x16x128xf32, #tpu.memory_space<vmem>>, vector<1x16x128xf32>
    %193 = vector.shape_cast %192 : vector<1x16x128xf32> to vector<16x128xf32>
    %194 = vector.shape_cast %191 : vector<16x128xf32> to vector<1x16x128xf32>
    tpu.vector_store %arg6[%c7_187, %c0_188, %c0_189], %194 {strides = array<i32>} : memref<8x16x128xf32, #tpu.memory_space<vmem>>, vector<1x16x128xf32>,
    return
  }
  func.func @transform_0(%arg0: i32) -> (i32, i32, i32) {
    %c0_i32 = arith.constant 0 : i32
    %c0_i32_0 = arith.constant 0 : i32
    %c0_i32_1 = arith.constant 0 : i32
    return %arg0, %c0_i32, %c0_i32_0 : i32, i32, i32
  }
  func.func @transform_1(%arg0: i32) -> (i32, i32, i32) {
    %c0_i32 = arith.constant 0 : i32
    %c0_i32_0 = arith.constant 0 : i32
    %c0_i32_1 = arith.constant 0 : i32
    %c0_i32_2 = arith.constant 0 : i32
    return %c0_i32, %c0_i32_0, %c0_i32_1 : i32, i32, i32
  }
  func.func @transform_2(%arg0: i32) -> (i32, i32) {
    %c0_i32 = arith.constant 0 : i32
    %c0_i32_0 = arith.constant 0 : i32
    %c0_i32_1 = arith.constant 0 : i32
    return %c0_i32, %c0_i32_0 : i32, i32
  }
  func.func @transform_3(%arg0: i32) -> (i32, i32, i32) {
    %c0_i32 = arith.constant 0 : i32
    %c0_i32_0 = arith.constant 0 : i32
    %c0_i32_1 = arith.constant 0 : i32
    %c0_i32_2 = arith.constant 0 : i32
    return %c0_i32, %c0_i32_0, %c0_i32_1 : i32, i32, i32
  }
  func.func @transform_4(%arg0: i32) -> (i32, i32) {
    %c0_i32 = arith.constant 0 : i32
    %c0_i32_0 = arith.constant 0 : i32
    %c0_i32_1 = arith.constant 0 : i32
    return %c0_i32, %c0_i32_0 : i32, i32
  }
  func.func @transform_5(%arg0: i32) -> (i32, i32, i32) {
    %c0_i32 = arith.constant 0 : i32
    %c0_i32_0 = arith.constant 0 : i32
    %c0_i32_1 = arith.constant 0 : i32
    return %arg0, %c0_i32, %c0_i32_0 : i32, i32, i32
  }
}

</mosaic_0001>

<bundles_post_ra>
// kernel: tpu_custom_call.1
= control target key start
LH: loop header
LB: loop body
LE: loop exit
PB: predicated region body
PF: predicated region fallthrough
CT: control target
= control target key end

     0   :  { %10 = vsyncpa [#allocation5], 0  ;;  %s4357_s0 = inlined_call_operand.hbm [shape: bf16[16,16,128], index: 0, kind: input, shape index: {}]   ;;  %s4358_s1 = inlined_call_operand.hbm [shape: bf16[3,128,128], index: 1, kind: input, shape index: {}]   ;;  %s4359_s2 = inlined_call_operand.vmem [shape: f32[1,128], index: 2, kind: input, shape index: {}]   ;;  %s4360_s3 = inlined_call_operand.hbm [shape: bf16[3,128,128], index: 3, kind: input, shape index: {}]   ;;  %s4361_s4 = inlined_call_operand.vmem [shape: f32[1,128], index: 4, kind: input, shape index: {}]   ;;  %s4362_s5 = inlined_call_operand.hbm [shape: f32[16,16,128], index: 5, kind: output, shape index: {}]  }
   0x1   :  { %12 = vsyncpa [#allocation5 + $0x1], 0 }
   0x2   :  { %13 = vsyncpa [#allocation8], 0 }
   0x3   :  { %14 = vsyncpa [#allocation6], 0 }
   0x4   :  { %16 = vsyncpa [#allocation6 + $0x1], 0  ;;  %s3312_s18 = smov 0   ;;  %s3314_s19 = smov 0  }
   0x5   :  { %s3316_s20 = smov 0   ;;  %s3318_s21 = smov 0  }
   0x6 LB: > { %s3333_s22 = sadd.s32 4294967295, %s3270_s21   ;;  %s2402_s23 = sadd.s32 4294967294, %s3270_s21   ;;  %s3270_s21 = sphi %s3318_s21, %s4551_s21   ;;  %s3266_s20 = sphi %s3316_s20, %s4550_s20   ;;  %s3262_s19 = sphi %s3314_s19, %s4549_s19   ;;  %s3258_s18 = sphi %s3312_s18, %s4548_s18  }
   0x7   : > { %p42_p0 = scmp.ne.s32.totalorder %s3262_s19, %s3258_s18  ;;  %p4363_p1 = scmp.eq.s32.totalorder %s3333_s22, 0 }
   0x8   : > { %p156_p3 = scmp.eq.s32.totalorder %s2402_s23, 1  ;;  %p2403_p5 = scmp.ge.s32.totalorder %s3270_s21, 1 }
   0x9   : > { %p3342_p4 = por %p4363_p1, %p42_p0  ;;  %p163_p7 = scmp.lt.s32.totalorder %s3270_s21, 3 }
   0xa   : > { %p3347_p6 = por %p156_p3, %p42_p0  ;;  %s3272_s27 = smov [#allocation7]  }
   0xb   : > { %s4391_s24 = scalar_select %p3342_p4, 1, 0 }
   0xc   : > { %s4392_s25 = scalar_select %p3347_p6, 1, 0 }
   0xd   : > { %p3352_p8 = pnand %p2403_p5, %p163_p7  ;;  %s175_s28 = sshll.u32 %s3272_s27, 4  ;;  %s3356_s28 = int_to_ptr.vmem [resolvable:$true] %s175_s28 }
   0xe   : > { %s3273_s30 = smov [#allocation9]   ;;  %s3114_s9 = scalar_lea.hbm %s4358_s1, 3072 }
   0xf   : > { %p2997_p9 = pneg %p3352_p8  ;;  %s191_s6 = sshll.u32 %s3273_s30, 4  ;;  %s3367_s6 = int_to_ptr.vmem [resolvable:$true] %s191_s6 }
  0x10   : > { %p3115_p12 = scmp.ne.s32.totalorder %s4358_s1, %s3114_s9  ;;  %p3121_p5 = scmp.lt.u32.totalorder %s3114_s9, %s4358_s1 }
  0x11   : > { %p3363_p11 = pnand %p2997_p9, %p4363_p1 }
  0x13   : > { %p3116_p13 = pneg %p3363_p11 }
  0x15   : > { %p3117_p0 = pnand %p3116_p13, %p3115_p12 }
  0x17   : > { %p3118_p3 = pneg %p3117_p0 }
  0x19   : > { %p3123_p7 = pnand %p3121_p5, %p3118_p3 }
  0x1b   : > { %3126 = shalt.err (!%p3123_p7)
}
  0x1c   : > { %s3127_s14 = scalar_lea.vmem %s3356_s28, 3072  ;;  %p3135_p2 = scmp.lt.s32.totalorder %s3356_s28, %s3356_s28 }
  0x1d   : > { %p3128_p9 = scmp.ne.s32.totalorder %s3356_s28, %s3127_s14  ;;  %p3136_p12 = scmp.lt.s32.totalorder %s3127_s14, %s3127_s14 }
  0x1f   : > { %p3130_p10 = pnand %p3128_p9, %p3116_p13  ;;  %p3137_p0 = por %p3136_p12, %p3135_p2 }
  0x21   : > { %p3131_p1 = pneg %p3130_p10 }
  0x23   : > { %p3138_p6 = pnand %p3137_p0, %p3131_p1 }
  0x25   : > { %3141 = shalt.err (!%p3138_p6)
}
  0x26   : > { %s3274_s15 = smov 64   ;;  %s3275_s16 = smov 4  }
  0x27   : > { %3000 = dma.hbm_to_vmem [thread:$0]  (!%p3363_p11), %s4358_s1, 3072, %s3356_s28, [#allocation8], %s3274_s15, %s3274_s15, %s3275_s16  }
  0x28   : > { %s3142_s7 = scalar_lea.hbm %s4360_s3, 3072 }
  0x29   : > { %p3143_p1 = scmp.ne.s32.totalorder %s4360_s3, %s3142_s7  ;;  %p3149_p10 = scmp.lt.u32.totalorder %s3142_s7, %s4360_s3 }
  0x2b   : > { %p3145_p2 = pnand %p3143_p1, %p3116_p13 }
  0x2d   : > { %p3146_p6 = pneg %p3145_p2 }
  0x2f   : > { %p3151_p3 = pnand %p3149_p10, %p3146_p6 }
  0x31   : > { %3154 = shalt.err (!%p3151_p3)
}
  0x32   : > { %s3155_s28 = scalar_lea.vmem %s3367_s6, 3072  ;;  %p3163_p12 = scmp.lt.s32.totalorder %s3367_s6, %s3367_s6 }
  0x33   : > { %p3156_p5 = scmp.ne.s32.totalorder %s3367_s6, %s3155_s28  ;;  %p3164_p0 = scmp.lt.s32.totalorder %s3155_s28, %s3155_s28 }
  0x35   : > { %p3158_p7 = pnand %p3156_p5, %p3116_p13  ;;  %p3165_p1 = por %p3164_p0, %p3163_p12 }
  0x37   : > { %p3159_p9 = pneg %p3158_p7 }
  0x39   : > { %p3166_p2 = pnand %p3165_p1, %p3159_p9 }
  0x3b   : > { %3169 = shalt.err (!%p3166_p2)
}
  0x3c   : > { %3003 = dma.hbm_to_vmem [thread:$0]  (!%p3363_p11), %s4360_s3, 3072, %s3367_s6, [#allocation8], %s3274_s15, %s3274_s15, %s3275_s16  }
  0x3d   : > { %s3428_s29 = sadd.s32 1, %s3270_s21   ;;  %s29_s14 = sadd.s32 1, %s3266_s20 }
  0x3e   : > { %s26_s17 = ssub.s32 %s3270_s21, %s3428_s29  ;;  %p36_p13 = scmp.ne.s32.totalorder %s3266_s20, %s3262_s19 }
  0x3f   : > { %p27_p6 = scmp.eq.s32.totalorder %s26_s17, 0  ;;  %p37_p10 = scmp.eq.s32.totalorder %s3270_s21, 0 }
  0x40   : > { %p4395_p3 = scmp.eq.s32.totalorder %s3333_s22, 1  ;;  %p3014_p7 = scmp.lt.s32.totalorder %s3270_s21, 2 }
  0x41   : > { %s3444_s27 = scalar_select %p27_p6, %s3266_s20, %s29_s14  }
  0x42   : > { %p3438_p5 = por %p4395_p3, %p36_p13  ;;  %p38_p9 = por %p37_p10, %p36_p13 }
  0x43   : > { %s208_s30 = sand.u32 1, %s3266_s20   ;;  %s2529_s6 = sshll.u32 %s3270_s21, 10 }
  0x44   : > { %s4396_s23 = scalar_select %p3438_p5, 1, 0 }
  0x45   : > { %s2407_s7 = sshll.u32 %s208_s30, 6  ;;  %s3451_s10 = scalar_lea.hbm %s4357_s0, %s2529_s6 }
  0x46   : > { %s212_s11 = scalar_lea.vmem [#allocation4], %s2407_s7  ;;  %p3455_p11 = pnand %p3014_p7, %p38_p9 }
  0x47   : > { %s220_s28 = sshll.u32 %s212_s11, 4  ;;  %s3459_s13 = scalar_lea.sflag [#allocation5], %s208_s30  ;;  %s3453_s28 = int_to_ptr.vmem [resolvable:$true] %s220_s28 }
  0x48   : > { %s3170_s14 = scalar_lea.hbm %s3451_s10, 1024  ;;  %p3172_p0 = pneg %p3455_p11 }
  0x49   : > { %p3171_p12 = scmp.ne.s32.totalorder %s3451_s10, %s3170_s14  ;;  %s3175_s6 = scalar_lea.hbm %s4357_s0, 2048 }
  0x4a   : > { %p3176_p13 = scmp.lt.u32.totalorder %s3451_s10, %s4357_s0  ;;  %p3177_p6 = scmp.lt.u32.totalorder %s3175_s6, %s3170_s14 }
  0x4b   : > { %p3173_p1 = pnand %p3172_p0, %p3171_p12  ;;  %p3179_p3 = scmp.lt.u32.totalorder %s3170_s14, %s3451_s10 }
  0x4c   : > { %p3178_p10 = por %p3177_p6, %p3176_p13 }
  0x4d   : > { %p3174_p2 = pneg %p3173_p1 }
  0x4e   : > { %p3180_p7 = por %p3179_p3, %p3178_p10 }
  0x50   : > { %p3181_p9 = pnand %p3180_p7, %p3174_p2 }
  0x52   : > { %3184 = shalt.err (!%p3181_p9)
}
  0x53   : > { %s3185_s30 = scalar_lea.vmem %s3453_s28, 1024  ;;  %s3276_s11 = smov [#allocation4]  }
  0x54   : > { %p3186_p12 = scmp.ne.s32.totalorder %s3453_s28, %s3185_s30  ;;  %s3190_s17 = sshll.u32 %s3276_s11, 4  ;;  %s3191_s17 = int_to_ptr.vmem [resolvable:$false] %s3190_s17 }
  0x55   : > { %s3192_s7 = scalar_lea.vmem %s3191_s17, 2048  ;;  %p3193_p4 = scmp.lt.s32.totalorder %s3453_s28, %s3191_s17 }
  0x56   : > { %p3188_p1 = pnand %p3186_p12, %p3172_p0  ;;  %p3194_p13 = scmp.lt.s32.totalorder %s3192_s7, %s3185_s30 }
  0x58   : > { %p3189_p5 = pneg %p3188_p1  ;;  %p3195_p6 = por %p3194_p13, %p3193_p4 }
  0x5a   : > { %p3196_p10 = pnand %p3195_p6, %p3189_p5 }
  0x5c   : > { %3199 = shalt.err (!%p3196_p10)
}
  0x5d   : > { %3007 = dma.hbm_to_vmem [thread:$0]  (!%p3455_p11), %s3451_s10, 1024, %s3453_s28, %s3459_s13, %s3274_s15, %s3274_s15, %s3275_s16  }
  0x5e   : > { %232 = sbr.rel (%p3352_p8) target bundleno = 843 (0x34b), region = 40  ;;  %s3493_s14 = sand.u32 (!%p3352_p8), 1, %s3262_s19  }
  0x5f   : > { %s2412_s6 = sshll.u32 (!%p3352_p8), %s3493_s14, 6  ;;  %s235_s8 = scalar_lea.sflag (!%p3352_p8), [#allocation5], %s3493_s14 }
  0x60   : > { %s3497_s9 = scalar_lea.vmem (!%p3352_p8), [#allocation4], %s2412_s6  ;;  %p4398_p4 = scmp.ne.s32.totalorder (!%p3352_p8), %s4391_s24, 0 }
  0x65   : > { %3245 = dma.done.wait (%p4398_p4), %s235_s8, 1024  }
  0x66   : > { %3247 = vsyncadd (%p4398_p4), %s235_s8, 4294966272  ;;  %p4399_p5 = scmp.eq.s32.totalorder %s3333_s22, 0 }
  0x68   : > { %3249 = dma.done.wait (%p4399_p5), [#allocation8], 6144   ;;  %p4400_p8 = pmov %p4399_p5 }
  0x69   : > { %v3277_v0 = vmov 0.0   ;;  %vm4367_vm0 = vmmov 0   ;;  %v3058_v1 = vld [vmem:[#allocation7 + $0x40] sm:$0xff]   ;;  %v3060_v3 = vld [vmem:[#allocation7 + $0x48] sm:$0xff]   ;;  %vm4366_vm1 = vsmask.f32 256 }
  0x6a   : > { %3251 = vsyncadd (%p4400_p8), [#allocation8], 4294961152  ;;  %2673 = vmatprep.subr.bf16.mxu0 %v3277_v0  ;;  %2725 = vmatprep.subr.bf16.mxu1 %v3277_v0  ;;  %v3059_v2 = vld [vmem:[#allocation7] sm:$0xff]   ;;  %v3061_v4 = vld [vmem:[#allocation7 + $0x8] sm:$0xff]   ;;  %vm282_vm2 = vsmask.f32 7938 }
  0x6b   : > { %2689 = vmatprep.mubr.msk.bf16.mxu0 %vm4367_vm0, %v3277_v0  ;;  %2741 = vmatprep.mubr.msk.bf16.mxu1 %vm4367_vm0, %v3277_v0  ;;  %v3062_v5 = vld [vmem:[#allocation7 + $0x50] sm:$0xff]   ;;  %vm276_vm3 = vcmask 1040384   ;;  %vm318_vm4 = vsmask.f32 1280  ;;  %vm323_vm6 = vsmask.f32 7942 }
  0x6c   : > { %2674 = vmatpush3.bf16.msra.mxu0 %v3058_v1  ;;  %2726 = vmatpush3.bf16.msra.mxu1 %v3059_v2  ;;  %v3063_v6 = vld [vmem:[#allocation7 + $0x10] sm:$0xff]   ;;  %vm3518_vm5 = vmand %vm276_vm3, %vm4366_vm1  ;;  %v3064_v8 = vld [vmem:[#allocation7 + $0x58] sm:$0xff]   ;;  %vm317_vm7 = vcmask 1041409   ;;  %vm4369_vm8 = vcmask 1047552   ;;  %vm351_vm10 = vcmask 1047553   ;;  %vm361_vm15 = vcmask 1042434  }
  0x6d   : > { %2675 = vmatprep.subr.bf16.mxu0 %v3277_v0  ;;  %2727 = vmatprep.subr.bf16.mxu1 %v3277_v0  ;;  %v3065_v9 = vld [vmem:[#allocation7 + $0x18] sm:$0xff]   ;;  %vm3525_vm9 = vmand %vm276_vm3, %vm282_vm2  ;;  %vm4370_vm11 = vsmask.f32 2304  ;;  %vm367_vm13 = vsmask.f32 7946  ;;  %v3066_v12 = vld [vmem:[#allocation7 + $0x60] sm:$0xff]  }
  0x6e   : > { %vm3531_vm12 = vmand %vm317_vm7, %vm318_vm4  ;;  %v3067_v13 = vld [vmem:[#allocation7 + $0x20] sm:$0xff]   ;;  %v3068_v14 = vld [vmem:[#allocation7 + $0x68] sm:$0xff]   ;;  %v4407_v27 = vmov 0  ;;  %v4409_v32 = vmov 0  ;;  %v4413_v41 = vmov 0  ;;  %v4415_v47 = vmov 0 }
  0x6f   : > { %v279_v15 = vld [vmem:[#allocation2] sm:$0x1]  ;;  %v284_v16 = vld [vmem:[#allocation2 + $0x8] sm:$0x1]  ;;  %v3069_v17 = vld [vmem:[#allocation7 + $0x28] sm:$0xff]   ;;  %vm4417_vm3 = vcmask 1041408  }
  0x70   : > { %2676 = vmatpush3.bf16.msra.mxu0 %v3060_v3  ;;  %2728 = vmatpush3.bf16.msra.mxu1 %v3061_v4  ;;  %v280_v18 = vsel %vm3518_vm5, 0, %v279_v15  ;;  %v285_v19 = vsel %vm3525_vm9, 0, %v284_v16  ;;  %v3074_v20 = vld [vmem:[%s3497_s9] sm:$0xff]   ;;  %v3075_v21 = vld [vmem:[%s3497_s9 + $0x8] sm:$0xff]   ;;  %v320_v22 = vld [vmem:[#allocation2 + $0x8] sm:$0x2] }
  0x71   : > { %2677 = vmatprep.subr.bf16.mxu0 %v3277_v0  ;;  %2729 = vmatprep.subr.bf16.mxu1 %v3277_v0  ;;  %281 = vst [vmem:[#allocation2] sm:$0x1] %v280_v18  ;;  %286 = vst [vmem:[#allocation2 + $0x8] sm:$0x1] %v285_v19  ;;  %v301_v23 = vshrl.u32 %v3074_v20, 16  ;;  %v304_v24 = vshll.u32 %v3074_v20, 16 }
  0x72   : > { %v321_v25 = vsel %vm3531_vm12, 0, %v320_v22  ;;  %v343_v26 = vshrl.u32 %v3075_v21, 16  ;;  %vm3548_vm0 = vmand %vm317_vm7, %vm323_vm6  ;;  %v3070_v28 = vld [vmem:[#allocation7 + $0x70] sm:$0xff]   ;;  %v346_v29 = vshll.u32 %v3075_v21, 16  ;;  %v325_v30 = vld [vmem:[#allocation2 + $0x10] sm:$0x2] }
  0x73   : > { %v4408_v27 = vsel %vm3548_vm0, 4294967295, %v4407_v27  ;;  %322 = vst [vmem:[#allocation2 + $0x8] sm:$0x2] %v321_v25  ;;  %v303_v31 = vrot.slane %v301_v23, 7  ;;  %vm3555_vm14 = vmand %vm4369_vm8, %vm282_vm2  ;;  %v326_v34 = vsel %vm3548_vm0, 0, %v325_v30  ;;  %v3077_v36 = vld [vmem:[%s3497_s9 + $0x10] sm:$0xff]  }
  0x74   : > { %2678 = vmatpush3.bf16.msra.mxu0 %v3062_v5  ;;  %2730 = vmatpush3.bf16.msra.mxu1 %v3063_v6  ;;  %v4410_v32 = vsel %vm3555_vm14, 4294967295, %v4409_v32  ;;  %v345_v33 = vrot.slane %v343_v26, 6  ;;  %v364_v35 = vld [vmem:[#allocation2 + $0x10] sm:$0x4]  ;;  %v348_v37 = vrot.slane %v346_v29, 7  ;;  %vm3564_vm7 = vmand %vm361_vm15, %vm4370_vm11  ;;  %v3071_v39 = vld [vmem:[#allocation7 + $0x30] sm:$0xff]  }
  0x75   : > { %2679 = vmatprep.subr.bf16.mxu0 %v3277_v0  ;;  %2731 = vmatprep.subr.bf16.mxu1 %v3277_v0  ;;  %327 = vst [vmem:[#allocation2 + $0x10] sm:$0x2] %v326_v34  ;;  %v306_v40 = vor.u32 %v304_v24, %v303_v31  ;;  %vm3571_vm2 = vmand %vm351_vm10, %vm323_vm6  ;;  %v365_v42 = vsel %vm3564_vm7, 0, %v364_v35  ;;  %v387_v43 = vshrl.u32 %v3077_v36, 16  ;;  %v390_v44 = vshll.u32 %v3077_v36, 16  ;;  %v3072_v45 = vld [vmem:[#allocation7 + $0x78] sm:$0xff]  }
  0x76   : > { %v4414_v41 = vsel %vm3571_vm2, 4294967295, %v4413_v41  ;;  %v349_v46 = vor.u32 %v348_v37, %v345_v33  ;;  %366 = vst [vmem:[#allocation2 + $0x10] sm:$0x4] %v365_v42  ;;  %vm3580_vm8 = vmand %vm361_vm15, %vm367_vm13  ;;  %v369_v48 = vld [vmem:[#allocation2 + $0x18] sm:$0x4]  ;;  %v3073_v49 = vld [vmem:[#allocation7 + $0x38] sm:$0xff]  }
  0x77   : > { %v4416_v47 = vsel %vm3580_vm8, 4294967295, %v4415_v47  ;;  %vm3586_vm1 = vmand %vm4417_vm3, %vm318_vm4  ;;  %v4418_v52 = vmov 0  ;;  %v389_v53 = vrot.slane %v387_v43, 5  ;;  %v392_v54 = vrot.slane %v390_v44, 6  ;;  %v408_v59 = vld [vmem:[#allocation2 + $0x18] sm:$0x8] }
  0x78   : > { %2680 = vmatpush3.bf16.msra.mxu0 %v3064_v8  ;;  %2732 = vmatpush3.bf16.msra.mxu1 %v3065_v9  ;;  %v311_v50 = vld [vmem:[#allocation2] sm:$0xff]  ;;  %v314_v51 = vld [vmem:[#allocation2 + $0x8] sm:$0x1]  ;;  %v4419_v52 = vsel %vm3586_vm1, 4294967295, %v4418_v52  ;;  %v370_v55 = vsel %vm3580_vm8, 0, %v369_v48  ;;  %vm4421_vm4 = vcmask 1043459  }
  0x79   : > { %2681 = vmatprep.subr.bf16.mxu0 %v3277_v0  ;;  %2733 = vmatprep.subr.bf16.mxu1 %v3277_v0  ;;  %v3594_v56 = vsel %vm3555_vm14, %v306_v40, %v311_v50  ;;  %v315_v57 = vsel %vm3518_vm5, %v303_v31, %v314_v51  ;;  %371 = vst [vmem:[#allocation2 + $0x18] sm:$0x4] %v370_v55  ;;  %vm4420_vm15 = vsmask.f32 3328  ;;  %v4422_v58 = vmov 0  ;;  %v3079_v1 = vld [vmem:[%s3497_s9 + $0x18] sm:$0xff]  }
  0x7a   : > { %vm3600_vm3 = vmand %vm4421_vm4, %vm4420_vm15  ;;  %313 = vst [vmem:[#allocation2] sm:$0xff] %v3594_v56  ;;  %v353_v60 = vld [vmem:[#allocation2 + $0x8] sm:$0xfe]  ;;  %v668_v61 = vshll.u32 %v3594_v56, 16  ;;  %vm4424_vm11 = vcmask 1047554   ;;  %v4425_v62 = vmov 0  ;;  %v393_v3 = vor.u32 %v392_v54, %v389_v53 }
  0x7b   : > { %v4423_v58 = vsel %vm3600_vm3, 4294967295, %v4422_v58  ;;  %316 = vst [vmem:[#allocation2 + $0x8] sm:$0x1] %v315_v57  ;;  %vm3609_vm14 = vmand %vm4424_vm11, %vm367_vm13  ;;  %v409_v63 = vsel %vm3600_vm3, 0, %v408_v59  ;;  %v354_v2 = vsel %vm3571_vm2, %v349_v46, %v353_v60  ;;  %v431_v5 = vshrl.u32 %v3079_v1, 16  ;;  %v3081_v21 = vld [vmem:[%s3497_s9 + $0x20] sm:$0xff]  }
  0x7c   : > { %2682 = vmatpush3.bf16.msra.mxu0 %v3066_v12  ;;  %2734 = vmatpush3.bf16.msra.mxu1 %v3067_v13  ;;  %v4426_v62 = vsel %vm3609_vm14, 4294967295, %v4425_v62  ;;  %410 = vst [vmem:[#allocation2 + $0x18] sm:$0x8] %v409_v63  ;;  %355 = vst [vmem:[#allocation2 + $0x8] sm:$0xfe] %v354_v2  ;;  %v434_v6 = vshll.u32 %v3079_v1, 16 }
  0x7d   : > { %2683 = vmatprep.subr.bf16.mxu0 %v3277_v0  ;;  %2735 = vmatprep.subr.bf16.mxu1 %v3277_v0  ;;  %v358_v4 = vld [vmem:[#allocation2 + $0x10] sm:$0x3]  ;;  %vm4427_vm11 = vsmask.f32 7950  ;;  %vm4428_vm13 = vmmov %vm4421_vm4  ;;  %v4429_v8 = vmov 0  ;;  %v666_v9 = vshrl.u32 %v3594_v56, 16 }
  0x7e   : > { %vm3621_vm10 = vmand %vm4428_vm13, %vm4427_vm11  ;;  %v359_v12 = vsel %vm3586_vm1, %v349_v46, %v358_v4  ;;  %vm4431_vm4 = vsmask.f32 2304  ;;  %vm4432_vm2 = vcmask 1042432   ;;  %v4433_v13 = vmov 0  ;;  %v452_v15 = vld [vmem:[#allocation2 + $0x20] sm:$0x10] }
  0x7f   : > { %v4430_v8 = vsel %vm3621_vm10, 4294967295, %v4429_v8  ;;  %vm3630_vm8 = vmand %vm4432_vm2, %vm4431_vm4  ;;  %360 = vst [vmem:[#allocation2 + $0x10] sm:$0x3] %v359_v12  ;;  %v397_v16 = vld [vmem:[#allocation2 + $0x10] sm:$0xfc]  ;;  %v436_v18 = vrot.slane %v434_v6, 5 }
  0x80   : > { %2684 = vmatpush3.bf16.msra.mxu0 %v3068_v14  ;;  %2736 = vmatpush3.bf16.msra.mxu1 %v3069_v17  ;;  %v4434_v13 = vsel %vm3630_vm8, 4294967295, %v4433_v13  ;;  %v413_v14 = vld [vmem:[#allocation2 + $0x20] sm:$0x8]  ;;  %v433_v17 = vrot.slane %v431_v5, 4  ;;  %vm4435_vm13 = vsmask.f32 4352  ;;  %v398_v23 = vsel %vm3609_vm14, %v393_v3, %v397_v16  ;;  %vm4439_vm2 = vmmov %vm4427_vm11 }
  0x81   : > { %2685 = vmatprep.subr.bf16.mxu0 %v3277_v0  ;;  %2737 = vmatprep.subr.bf16.mxu1 %v3277_v0  ;;  %v414_v19 = vsel %vm3621_vm10, 0, %v413_v14  ;;  %vm4436_vm15 = vcmask 1044484   ;;  %v4437_v20 = vmov 0  ;;  %v670_v22 = vrot.slane %v668_v61, 1  ;;  %399 = vst [vmem:[#allocation2 + $0x10] sm:$0xfc] %v398_v23 }
  0x82   : > { %vm3639_vm6 = vmand %vm4436_vm15, %vm4435_vm13  ;;  %vm4440_vm4 = vcmask 1047555   ;;  %v4441_v24 = vmov 0  ;;  %415 = vst [vmem:[#allocation2 + $0x20] sm:$0x8] %v414_v19  ;;  %v402_v26 = vld [vmem:[#allocation2 + $0x18] sm:$0x7] }
  0x83   : > { %v4438_v20 = vsel %vm3639_vm6, 4294967295, %v4437_v20  ;;  %vm3648_vm11 = vmand %vm4440_vm4, %vm4439_vm2  ;;  %v453_v25 = vsel %vm3639_vm6, 0, %v452_v15  ;;  %v475_v29 = vshrl.u32 %v3081_v21, 16  ;;  %v478_v30 = vshll.u32 %v3081_v21, 16  ;;  %v457_v34 = vld [vmem:[#allocation2 + $0x28] sm:$0x10] }
  0x84   : > { %2686 = vmatpush3.bf16.msra.mxu0 %v3070_v28  ;;  %2738 = vmatpush3.bf16.msra.mxu1 %v3071_v39  ;;  %v4442_v24 = vsel %vm3648_vm11, 4294967295, %v4441_v24  ;;  %v437_v28 = vor.u32 %v436_v18, %v433_v17  ;;  %454 = vst [vmem:[#allocation2 + $0x20] sm:$0x10] %v453_v25  ;;  %vm4443_vm15 = vsmask.f32 7954  ;;  %vm4444_vm13 = vcmask 1044484  }
  0x85   : > { %2687 = vmatprep.subr.bf16.mxu0 %v3277_v0  ;;  %2739 = vmatprep.subr.bf16.mxu1 %v3277_v0  ;;  %vm3657_vm1 = vmand %vm4444_vm13, %vm4443_vm15  ;;  %v4445_v31 = vmov 0  ;;  %v403_v33 = vsel %vm3630_vm8, %v393_v3, %v402_v26  ;;  %vm4447_vm4 = vmmov 0   ;;  %v441_v35 = vld [vmem:[#allocation2 + $0x18] sm:$0xf8]  ;;  %vm4448_vm14 = vsmask.f32 3328 }
  0x86   : > { %v4446_v31 = vsel %vm3657_vm1, 4294967295, %v4445_v31  ;;  %404 = vst [vmem:[#allocation2 + $0x18] sm:$0x7] %v403_v33  ;;  %vm4449_vm10 = vcmask 1043456   ;;  %v4450_v36 = vmov 0  ;;  %v477_v37 = vrot.slane %v475_v29, 3 }
  0x87   : > { %vm3668_vm6 = vmand %vm4449_vm10, %vm4448_vm14  ;;  %v480_v39 = vrot.slane %v478_v30, 4  ;;  %v458_v40 = vsel %vm3657_vm1, 0, %v457_v34  ;;  %v3083_v42 = vld [vmem:[%s3497_s9 + $0x28] sm:$0xff]   ;;  %v3675_v43 = vld [vmem:[#allocation2 + $0x8] sm:$0xff]  ;;  %v442_v44 = vsel %vm3648_vm11, %v437_v28, %v441_v35  ;;  %vm4452_vm15 = vsmask.f32 5376 }
  0x88   : > { %2688 = vmatpush3.bf16.msra.mxu0 %v3072_v45  ;;  %2740 = vmatpush3.bf16.msra.mxu1 %v3073_v49  ;;  %v4451_v36 = vsel %vm3668_vm6, 4294967295, %v4450_v36  ;;  %459 = vst [vmem:[#allocation2 + $0x28] sm:$0x10] %v458_v40  ;;  %vm4453_vm13 = vcmask 1045509   ;;  %v4454_v45 = vmov 0  ;;  %v671_v48 = vor.u32 %v670_v22, %v666_v9  ;;  %v3076_v50 = vld [vmem:[#allocation7 + $0x80] sm:$0xff]  }
  0x89   : > { %2777 = vmatprep.subr.bf16.mxu0 %v3277_v0  ;;  %2829 = vmatprep.subr.bf16.mxu1 %v3277_v0  ;;  %vm3681_vm2 = vmand %vm4453_vm13, %vm4452_vm15  ;;  %v496_v46 = vld [vmem:[#allocation2 + $0x28] sm:$0x20]  ;;  %v673_v49 = vshll.u32 %v3675_v43, 16  ;;  %443 = vst [vmem:[#allocation2 + $0x18] sm:$0xf8] %v442_v44  ;;  %vm4457_vm1 = vcmask 1047556   ;;  %v481_v54 = vor.u32 %v480_v39, %v477_v37 }
  0x8a   : > { %v4455_v45 = vsel %vm3681_vm2, 4294967295, %v4454_v45  ;;  %vm4456_vm8 = vsmask.f32 7954  ;;  %v4458_v51 = vmov 0  ;;  %v497_v53 = vsel %vm3681_vm2, 0, %v496_v46  ;;  %v3707_v1 = vld [vmem:[#allocation2 + $0x10] sm:$0xff] }
  0x8b   : > { %2742 = vmatmul.mubr.bf16.vlgmr.msra.gmra.mrb[0].mxu1 %v3594_v56  ;;  %vm3688_vm3 = vmand %vm4457_vm1, %vm4456_vm8  ;;  %vm4460_vm13 = vsmask.f32 4352  ;;  %vm4461_vm11 = vcmask 1044480   ;;  %v4462_v55 = vmov 0  ;;  %498 = vst [vmem:[#allocation2 + $0x28] sm:$0x20] %v497_v53 }
  0x8c   : > { %2745 = vmatprep.mubr.msk.bf16.mxu1 %vm4447_vm4, %v3277_v0  ;;  %v4459_v51 = vsel %vm3688_vm3, 4294967295, %v4458_v51  ;;  %vm3696_vm14 = vmand %vm4461_vm11, %vm4460_vm13  ;;  %v519_v56 = vshrl.u32 %v3083_v42, 16  ;;  %v522_v57 = vshll.u32 %v3083_v42, 16  ;;  %v675_v59 = vrot.slane %v673_v49, 1  ;;  %v446_v61 = vld [vmem:[#allocation2 + $0x20] sm:$0xf] }
  0x8d   : > { %v4463_v55 = vsel %vm3696_vm14, 4294967295, %v4462_v55  ;;  %v677_v60 = vshrl.u32 %v3675_v43, 16  ;;  %vm4464_vm1 = vsmask.f32 7958  ;;  %vm4465_vm8 = vcmask 1045509   ;;  %v3078_v14 = vld [vmem:[#allocation7 + $0x88] sm:$0xff]  }
  0x8e   : > { %vm3703_vm10 = vmand %vm4465_vm8, %vm4464_vm1  ;;  %v447_v2 = vsel %vm3668_vm6, %v437_v28, %v446_v61  ;;  %v485_v3 = vld [vmem:[#allocation2 + $0x20] sm:$0xf0]  ;;  %v521_v4 = vrot.slane %v519_v56, 2  ;;  %v524_v5 = vrot.slane %v522_v57, 3  ;;  %vm4468_vm11 = vsmask.f32 6400 }
  0x8f   : > { %vm4469_vm13 = vcmask 1046534   ;;  %vm4472_vm2 = vsmask.f32 7424  ;;  %v681_v12 = vshll.u32 %v3707_v1, 16  ;;  %448 = vst [vmem:[#allocation2 + $0x20] sm:$0xf] %v447_v2  ;;  %v486_v18 = vsel %vm3688_vm3, %v481_v54, %v485_v3 }
  0x90   : > { %vm3713_vm15 = vmand %vm4469_vm13, %vm4468_vm11  ;;  %v676_v9 = vsel %vm4472_vm2, %v671_v48, %v675_v59  ;;  %vm4473_vm8 = vcmask 1047557   ;;  %v4474_v15 = vmov 0  ;;  %v501_v16 = vld [vmem:[#allocation2 + $0x30] sm:$0x20]  ;;  %v540_v17 = vld [vmem:[#allocation2 + $0x30] sm:$0x40]  ;;  %v3728_v19 = vor.u32 %v524_v5, %v521_v4 }
  0x91   : > { %vm3721_vm0 = vmand %vm4473_vm8, %vm4464_vm1  ;;  %vm4386_vm6 = vcmask 1047559   ;;  %2690 = vmatmul.mubr.bf16.vlgmr.msra.gmra.mrb[0].mxu0 %v676_v9  ;;  %v502_v21 = vsel %vm3703_vm10, 0, %v501_v16  ;;  %v541_v22 = vsel %vm3713_vm15, 0, %v540_v17  ;;  %vm4476_vm2 = vsmask.f32 7962  ;;  %v3085_v29 = vld [vmem:[%s3497_s9 + $0x30] sm:$0xff]  }
  0x92   : > { %v4475_v15 = vsel %vm3721_vm0, 4294967295, %v4474_v15  ;;  %vm4477_vm11 = vmmov %vm4469_vm13  ;;  %v4478_v23 = vmov 0  ;;  %2778 = vmatpush3.bf16.msra.mxu0 %v3076_v50  ;;  %2693 = vmatprep.mubr.msk.bf16.mxu0 %vm4447_vm4, %v3277_v0  ;;  %v679_v25 = vor.u32 %v677_v60, %v675_v59  ;;  %v683_v26 = vrot.slane %v681_v12, 1  ;;  %487 = vst [vmem:[#allocation2 + $0x20] sm:$0xf0] %v486_v18  ;;  %v3746_v30 = vld [vmem:[#allocation2 + $0x18] sm:$0xff] }
  0x93   : > { %2746 = vmatmul.mubr.bf16.gmra.mrb[4].mxu1 %v3675_v43  ;;  %vm3736_vm13 = vmand %vm4477_vm11, %vm4476_vm2  ;;  %v490_v28 = vld [vmem:[#allocation2 + $0x28] sm:$0x1f]  ;;  %503 = vst [vmem:[#allocation2 + $0x30] sm:$0x20] %v502_v21  ;;  %2779 = vmatprep.subr.bf16.mxu0 %v3277_v0  ;;  %v685_v33 = vshrl.u32 %v3707_v1, 16  ;;  %vm4388_vm1 = vcmask 1045504  }
  0x94   : > { %v4479_v23 = vsel %vm3736_vm13, 4294967295, %v4478_v23  ;;  %542 = vst [vmem:[#allocation2 + $0x30] sm:$0x40] %v541_v22  ;;  %2749 = vmatprep.mubr.msk.bf16.mxu1 %vm4447_vm4, %v3277_v0  ;;  %v491_v34 = vsel %vm3696_vm14, %v481_v54, %v490_v28  ;;  %v3080_v35 = vld [vmem:[#allocation7 + $0x90] sm:$0xff]   ;;  %v529_v37 = vld [vmem:[#allocation2 + $0x28] sm:$0xe0] }
  0x95   : > { %492 = vst [vmem:[#allocation2 + $0x28] sm:$0x1f] %v491_v34  ;;  %v545_v39 = vld [vmem:[#allocation2 + $0x38] sm:$0x40]  ;;  %v530_v40 = vsel %vm3721_vm0, %v3728_v19, %v529_v37  ;;  %v563_v42 = vshrl.u32 %v3085_v29, 16  ;;  %v566_v44 = vshll.u32 %v3085_v29, 16  ;;  %v687_v4 = vor.u32 %v685_v33, %v683_v26 }
  0x96   : > { %v546_v46 = vsel %vm3736_vm13, 0, %v545_v39  ;;  %vm4480_vm11 = vsmask.f32 7424  ;;  %v584_v49 = vld [vmem:[#allocation2 + $0x38] sm:$0x80]  ;;  %v3087_v50 = vld [vmem:[%s3497_s9 + $0x38] sm:$0xff]   ;;  %2780 = vmatpush3.bf16.msra.mxu0 %v3078_v14 }
  0x97   : > { %vm3758_vm3 = vmand %vm4386_vm6, %vm4480_vm11  ;;  %v689_v54 = vshll.u32 %v3746_v30, 16  ;;  %531 = vst [vmem:[#allocation2 + $0x28] sm:$0xe0] %v530_v40  ;;  %2781 = vmatprep.subr.bf16.mxu0 %v3277_v0  ;;  %vm4484_vm2 = vsmask.f32 5376  ;;  %v565_v59 = vrot.slane %v563_v42, 1 }
  0x98   : > { %vm4483_vm8 = vmmov %vm4480_vm11  ;;  %547 = vst [vmem:[#allocation2 + $0x38] sm:$0x40] %v546_v46  ;;  %v585_v56 = vsel %vm3758_vm3, 0, %v584_v49  ;;  %v568_v60 = vrot.slane %v566_v44, 2  ;;  %v607_v61 = vshll.u32 %v3087_v50, 16  ;;  %vm4488_vm6 = vcmask 1047558  }
  0x99   : > { %v684_v53 = vsel %vm4483_vm8, %v679_v25, %v683_v26  ;;  %vm3770_vm11 = vmand %vm4388_vm1, %vm4484_vm2  ;;  %586 = vst [vmem:[#allocation2 + $0x38] sm:$0x80] %v585_v56  ;;  %vm4487_vm8 = vsmask.f32 7962  ;;  %v589_v3 = vld [vmem:[#allocation2 + $0x40] sm:$0x80] }
  0x9a   : > { %vm3776_vm14 = vmand %vm4488_vm6, %vm4487_vm8  ;;  %2694 = vmatmul.mubr.bf16.gmra.mrb[4].mxu0 %v684_v53  ;;  %v534_v5 = vld [vmem:[#allocation2 + $0x30] sm:$0x3f]  ;;  %v569_v9 = vor.u32 %v568_v60, %v565_v59  ;;  %vm576_vm2 = vcmask 1046528   ;;  %vm4491_vm1 = vsmask.f32 7966  ;;  %vm4492_vm0 = vcmask 1047559  }
  0x9b   : > { %2750 = vmatmul.mubr.bf16.gmra.mrb[8].mxu1 %v3707_v1  ;;  %v573_v12 = vld [vmem:[#allocation2 + $0x30] sm:$0xc0]  ;;  %vm3783_vm13 = vmand %vm4492_vm0, %vm4491_vm1  ;;  %v1079_v16 = vrot.slane %v3675_v43, 1  ;;  %2697 = vmatprep.mubr.msk.bf16.mxu0 %vm4447_vm4, %v3277_v0  ;;  %v691_v17 = vrot.slane %v689_v54, 1  ;;  %v3082_v18 = vld [vmem:[#allocation7 + $0x98] sm:$0xff]   ;;  %v535_v21 = vsel %vm3770_vm11, %v3728_v19, %v534_v5  ;;  %v610_v25 = vshrl.u32 %v3087_v50, 16 }
  0x9c   : > { %2782 = vmatpush3.bf16.msra.mxu0 %v3080_v35  ;;  %v590_v22 = vsel %vm3783_vm13, 0, %v589_v3  ;;  %2753 = vmatprep.mubr.msk.bf16.mxu1 %vm4447_vm4, %v3277_v0  ;;  %v626_v26 = vld [vmem:[#allocation2 + $0x20] sm:$0xff]  ;;  %536 = vst [vmem:[#allocation2 + $0x30] sm:$0x3f] %v535_v21  ;;  %v574_v28 = vsel %vm3776_vm14, %v569_v9, %v573_v12  ;;  %v609_v29 = vrot.slane %v607_v61, 1  ;;  %v1081_v33 = vrot.slane %v3707_v1, 1 }
  0x9d   : > { %2783 = vmatprep.subr.bf16.mxu0 %v3277_v0  ;;  %591 = vst [vmem:[#allocation2 + $0x40] sm:$0x80] %v590_v22  ;;  %v1083_v19 = vrot.slane %v3746_v30, 1  ;;  %575 = vst [vmem:[#allocation2 + $0x30] sm:$0xc0] %v574_v28  ;;  %v1085_v35 = vrot.slane %v626_v26, 1 }
  0x9e   : > { %vm4495_vm0 = vsmask.f32 6400  ;;  %v693_v37 = vshrl.u32 %v3746_v30, 16  ;;  %v3084_v39 = vld [vmem:[#allocation7 + $0xa0] sm:$0xff]   ;;  %v3812_v42 = vsel %vm576_vm2, %v1079_v16, %v1081_v33  ;;  %vm4498_vm1 = vsmask.f32 7424 }
  0x9f   : > { %vm3804_vm6 = vmand %vm576_vm2, %vm4495_vm0  ;;  %v578_v40 = vld [vmem:[#allocation2 + $0x38] sm:$0x7f]  ;;  %v3815_v1 = vsel %vm576_vm2, %v1081_v33, %v1083_v19  ;;  %v692_v44 = vsel %vm4498_vm1, %v687_v4, %v691_v17  ;;  %v697_v46 = vshll.u32 %v626_v26, 16  ;;  %v627_v49 = vld [vmem:[#allocation2 + $0x28] sm:$0xff]  ;;  %v612_v56 = vor.u32 %v610_v25, %v609_v29  ;;  %s2415_s10 = sshll.u32 %s3493_s14, 7  ;;  %s2531_s12 = sshll.u32 %s3333_s22, 11 }
  0xa0   : > { %2784 = vmatpush3.bf16.msra.mxu0 %v3082_v18  ;;  %v615_v50 = vld [vmem:[#allocation2 + $0x38] sm:$0x80]  ;;  %v579_v53 = vsel %vm3804_vm6, %v569_v9, %v578_v40  ;;  %v3824_v59 = vsel %vm576_vm2, %v1083_v19, %v1085_v35  ;;  %vm4499_vm8 = vmmov %vm4498_vm1  ;;  %vm4500_vm0 = vcmask 1047552   ;;  %v1087_v61 = vrot.slane %v627_v49, 1  ;;  %v3088_v28 = vld [vmem:[#allocation7 + $0xb0] sm:$0xff]   ;;  %s4238_s28 = scalar_lea.vmem [#allocation10], %s2415_s10  ;;  %s4309_s17 = scalar_lea.hbm %s4362_s5, %s2531_s12 }
  0xa1   : > { %2785 = vmatprep.subr.bf16.mxu0 %v3277_v0  ;;  %v616_v54 = vsel %vm3783_vm13, %v609_v29, %v615_v50  ;;  %580 = vst [vmem:[#allocation2 + $0x38] sm:$0x7f] %v579_v53  ;;  %vm3828_vm1 = vmand %vm4500_vm0, %vm4499_vm8  ;;  %v695_v3 = vor.u32 %v693_v37, %v691_v17  ;;  %v699_v4 = vrot.slane %v697_v46, 1  ;;  %v3086_v12 = vld [vmem:[#allocation7 + $0xa8] sm:$0xff]   ;;  %v701_v22 = vshrl.u32 %v626_v26, 16  ;;  %v3089_v40 = vld [vmem:[#allocation7 + $0xb8] sm:$0xff]  }
  0xa2   : > { %617 = vst [vmem:[#allocation2 + $0x38] sm:$0x80] %v616_v54  ;;  %2698 = vmatmul.mubr.bf16.gmra.mrb[8].mxu0 %v692_v44  ;;  %v3838_v9 = vsel %vm576_vm2, %v1085_v35, %v1087_v61  ;;  %v705_v25 = vshll.u32 %v627_v49, 16  ;;  %v709_v44 = vshrl.u32 %v627_v49, 16  ;;  %vm4503_vm0 = vmmov %vm4499_vm8  ;;  %v3090_v43 = vld [vmem:[#allocation9 + $0x40] sm:$0xff]   ;;  %v3103_v11 = vld [vmem:[#allocation9 + $0x70] sm:$0xff]  }
  0xa3   : > { %2754 = vmatmul.mubr.bf16.gmra.mrb[12].mxu1 %v3746_v30  ;;  %2701 = vmatprep.mubr.msk.bf16.mxu0 %vm4447_vm4, %v3277_v0  ;;  %v700_v17 = vsel %vm4499_vm8, %v695_v3, %v699_v4  ;;  %v703_v37 = vor.u32 %v701_v22, %v699_v4  ;;  %vm4504_vm8 = vmmov %vm4503_vm0  ;;  %v372_v10 = vld [vmem:[#allocation3 + $0x10] sm:$0x4]  ;;  %s2310_s13 = sshll.u32 %s4238_s28, 4  ;;  %s2296_s7 = scalar_lea.sflag [#allocation6], %s3493_s14  ;;  %s4311_s13 = int_to_ptr.vmem [resolvable:$true] %s2310_s13 }
  0xa4   : > { %2757 = vmatprep.mubr.msk.bf16.mxu1 %vm4447_vm4, %v3277_v0  ;;  %v619_v5 = vld [vmem:[#allocation2 + $0x40] sm:$0xff]  ;;  %2786 = vmatpush3.bf16.msra.mxu0 %v3084_v39  ;;  %v628_v21 = vld [vmem:[#allocation2 + $0x30] sm:$0xff]  ;;  %v707_v39 = vrot.slane %v705_v25, 1  ;;  %s3200_s6 = scalar_lea.vmem %s4311_s13, 2048  ;;  %p4545_p0 = scmp.ne.s32.totalorder %s4396_s23, 0 }
  0xa5   : > { %v3842_v18 = vsel %vm3828_vm1, %v612_v56, %v619_v5  ;;  %2787 = vmatprep.subr.bf16.mxu0 %v3277_v0  ;;  %v1089_v30 = vrot.slane %v628_v21, 1  ;;  %v713_v46 = vshll.u32 %v628_v21, 16  ;;  %v717_v3 = vshrl.u32 %v628_v21, 16  ;;  %2830 = vmatpush3.bf16.msra.mxu1 %v3090_v43  ;;  %p3201_p11 = scmp.ne.s32.totalorder %s4311_s13, %s3200_s6  ;;  %s3279_s22 = smov [#allocation10]  }
  0xa6   : > { %621 = vst [vmem:[#allocation2 + $0x40] sm:$0xff] %v3842_v18  ;;  %v1093_v33 = vrot.slane %v3842_v18, 1  ;;  %v711_v54 = vor.u32 %v709_v44, %v707_v39  ;;  %2831 = vmatprep.subr.bf16.mxu1 %v3277_v0  ;;  %v287_v44 = vld [vmem:[#allocation3] sm:$0x1]  ;;  %s3204_s8 = sshll.u32 %s3279_s22, 4  ;;  %s3205_s8 = int_to_ptr.vmem [resolvable:$false] %s3204_s8 }
  0xa7   : > { %v3848_v29 = vsel %vm576_vm2, %v1087_v61, %v1089_v30  ;;  %v715_v56 = vrot.slane %v713_v46, 1  ;;  %v290_v46 = vld [vmem:[#allocation3 + $0x8] sm:$0x1]  ;;  %p3202_p2 = pnand %p3201_p11, %p4545_p0  ;;  %p3207_p7 = scmp.lt.s32.totalorder %s4311_s13, %s3205_s8 }
  0xa8   : > { %2788 = vmatpush3.bf16.msra.mxu0 %v3086_v12 }
  0xa9   : > { %v629_v19 = vld [vmem:[#allocation2 + $0x38] sm:$0xff]  ;;  %2789 = vmatprep.subr.bf16.mxu0 %v3277_v0  ;;  %v716_v61 = vsel %vm4504_vm8, %v711_v54, %v715_v56  ;;  %v719_v5 = vor.u32 %v717_v3, %v715_v56  ;;  %vm4505_vm8 = vmmov %vm4503_vm0  ;;  %v3102_v54 = vld [vmem:[#allocation9 + $0x30] sm:$0xff]   ;;  %p3203_p3 = pneg %p3202_p2 }
  0xaa   : > { %2702 = vmatmul.mubr.bf16.gmra.mrb[12].mxu0 %v700_v17  ;;  %v1091_v35 = vrot.slane %v629_v19, 1  ;;  %v721_v4 = vshll.u32 %v629_v19, 16  ;;  %v729_v17 = vshll.u32 %v3842_v18, 16  ;;  %v3104_v56 = vld [vmem:[#allocation9 + $0x38] sm:$0xff]  }
  0xab   : > { %2758 = vmatmul.mubr.bf16.gmra.mrb[16].mxu1 %v626_v26  ;;  %2705 = vmatprep.mubr.msk.bf16.mxu0 %vm4447_vm4, %v3277_v0  ;;  %v708_v26 = vsel %vm4503_vm0, %v703_v37, %v707_v39  ;;  %v1051_v37 = vld [vmem:[#allocation2] sm:$0xfe] }
  0xac   : > { %2761 = vmatprep.mubr.msk.bf16.mxu1 %vm4447_vm4, %v3277_v0  ;;  %2790 = vmatpush3.bf16.msra.mxu0 %v3088_v28  ;;  %v1092_v50 = vsel %vm576_vm2, %v1089_v30, %v1091_v35  ;;  %v1094_v53 = vsel %vm576_vm2, %v1091_v35, %v1093_v33  ;;  %v723_v12 = vrot.slane %v721_v4, 1  ;;  %v725_v30 = vshrl.u32 %v629_v19, 16  ;;  %v3097_v4 = vld [vmem:[#allocation9 + $0x60] sm:$0xff]  }
  0xad   : > { %2791 = vmatprep.subr.bf16.mxu0 %v3277_v0  ;;  %v630_v28 = vld [vmem:[#allocation2 + $0x40] sm:$0x7f]  ;;  %v733_v35 = vshrl.u32 %v3842_v18, 16  ;;  %v1078_v39 = vrot.slane %v1051_v37, 1  ;;  %v3094_v18 = vld [vmem:[#allocation9 + $0x58] sm:$0xff]  }
  0xae   : > { %v727_v22 = vor.u32 %v725_v30, %v723_v12  ;;  %v3100_v30 = vld [vmem:[#allocation9 + $0x68] sm:$0xff]   ;;  %v463_v37 = vld [vmem:[#allocation3 + $0x28] sm:$0x10] }
  0xb0   : > { %2792 = vmatpush3.bf16.msra.mxu0 %v3089_v40  ;;  %v1080_v40 = vsel %vm576_vm2, %v1078_v39, %v1079_v16  ;;  %v3091_v16 = vld [vmem:[#allocation9 + $0x48] sm:$0xff]  }
  0xb1   : > { %2881 = vmatprep.subr.bf16.mxu0 %v3277_v0  ;;  %2832 = vmatpush3.bf16.msra.mxu1 %v3091_v16 }
  0xb2   : > { %2706 = vmatmul.mubr.bf16.gmra.mrb[16].mxu0 %v708_v26  ;;  %2833 = vmatprep.subr.bf16.mxu1 %v3277_v0  ;;  %v291_v26 = vsel %vm3525_vm9, 0, %v290_v46  ;;  %vm4506_vm9 = vnez %v4408_v27  ;;  %v3105_v27 = vld [vmem:[#allocation9 + $0x78] sm:$0xff]  }
  0xb3   : > { %2762 = vmatmul.mubr.bf16.gmra.mrb[20].mxu1 %v627_v49  ;;  %2709 = vmatprep.mubr.msk.bf16.mxu0 %vm4447_vm4, %v3277_v0  ;;  %v724_v49 = vsel %vm4503_vm0, %v719_v5, %v723_v12  ;;  %292 = vst [vmem:[#allocation3 + $0x8] sm:$0x1] %v291_v26  ;;  %v331_v5 = vld [vmem:[#allocation3 + $0x10] sm:$0x2]  ;;  %v373_v12 = vsel %vm3564_vm7, 0, %v372_v10  ;;  %vm4508_vm0 = vnez %v4416_v47  ;;  %vm4509_vm7 = vnez %v4438_v20 }
  0xb4   : > { %2765 = vmatprep.mubr.msk.bf16.mxu1 %vm4447_vm4, %v3277_v0  ;;  %374 = vst [vmem:[#allocation3 + $0x10] sm:$0x4] %v373_v12  ;;  %v504_v47 = vld [vmem:[#allocation3 + $0x28] sm:$0x20]  ;;  %v592_v26 = vld [vmem:[#allocation3 + $0x38] sm:$0x80] }
  0xb5   : > { %v551_v10 = vld [vmem:[#allocation3 + $0x38] sm:$0x40] }
  0xba   : > { %2710 = vmatmul.mubr.bf16.gmra.mrb[20].mxu0 %v716_v61  ;;  %v328_v61 = vld [vmem:[#allocation3 + $0x8] sm:$0x2] }
  0xbb   : > { %2766 = vmatmul.mubr.bf16.gmra.mrb[24].mxu1 %v628_v21  ;;  %2713 = vmatprep.mubr.msk.bf16.mxu0 %vm4447_vm4, %v3277_v0  ;;  %v731_v21 = vrot.slane %v729_v17, 1  ;;  %v329_v3 = vsel %vm3531_vm12, 0, %v328_v61  ;;  %v416_v17 = vld [vmem:[#allocation3 + $0x18] sm:$0x8]  ;;  %vm4507_vm12 = vnez %v4423_v58 }
  0xbc   : > { %2769 = vmatprep.mubr.msk.bf16.mxu1 %vm4447_vm4, %v3277_v0  ;;  %330 = vst [vmem:[#allocation3 + $0x8] sm:$0x2] %v329_v3 }
  0xbd   : > { %v732_v25 = vsel %vm4505_vm8, %v727_v22, %v731_v21  ;;  %v375_v22 = vld [vmem:[#allocation3 + $0x18] sm:$0x4]  ;;  %vm4510_vm8 = vnez %v4430_v8  ;;  %v548_v8 = vld [vmem:[#allocation3 + $0x30] sm:$0x40] }
  0xbe   : > { %v376_v38 = vsel %vm4508_vm0, 0, %v375_v22  ;;  %vm4517_vm0 = vnez %v4426_v62 }
  0xbf   : > { %377 = vst [vmem:[#allocation3 + $0x18] sm:$0x4] %v376_v38 }
  0xc2   : > { %2714 = vmatmul.mubr.bf16.gmra.mrb[24].mxu0 %v724_v49  ;;  %v332_v49 = vsel %vm4506_vm9, 0, %v331_v5  ;;  %vm4511_vm9 = vnez %v4455_v45 }
  0xc3   : > { %2770 = vmatmul.mubr.bf16.gmra.mrb[28].mxu1 %v629_v19  ;;  %2717 = vmatprep.mubr.msk.bf16.mxu0 %vm4447_vm4, %v3277_v0  ;;  %v735_v19 = vor.u32 %v733_v35, %v731_v21  ;;  %333 = vst [vmem:[#allocation3 + $0x10] sm:$0x2] %v332_v49  ;;  %v417_v21 = vsel %vm4507_vm12, 0, %v416_v17  ;;  %v505_v39 = vsel %vm4511_vm9, 0, %v504_v47  ;;  %vm4512_vm12 = vnez %v4446_v31 }
  0xc4   : > { %2773 = vmatprep.mubr.msk.bf16.mxu1 %vm4447_vm4, %v3277_v0  ;;  %418 = vst [vmem:[#allocation3 + $0x18] sm:$0x8] %v417_v21  ;;  %v464_v43 = vsel %vm4512_vm12, 0, %v463_v37  ;;  %506 = vst [vmem:[#allocation3 + $0x28] sm:$0x20] %v505_v39  ;;  %v549_v31 = vsel %vm3713_vm15, 0, %v548_v8  ;;  %vm4521_vm12 = vnez %v4442_v24 }
  0xc5   : > { %465 = vst [vmem:[#allocation3 + $0x28] sm:$0x10] %v464_v43  ;;  %550 = vst [vmem:[#allocation3 + $0x30] sm:$0x40] %v549_v31  ;;  %vm4516_vm15 = vsmask.f32 256 }
  0xc6   : > { %vm4520_vm9 = vmmov %vm4516_vm15 }
  0xca   : > { %2718 = vmatmul.mubr.bf16.gmra.mrb[28].mxu0 %v732_v25  ;;  %v460_v25 = vld [vmem:[#allocation3 + $0x20] sm:$0x10] }
  0xcb   : > { %2774 = vmatmul.mubr.bf16.gmra.mrb[32].mxu1 %v630_v28  ;;  %2721 = vmatprep.mubr.msk.bf16.mxu0 %vm4447_vm4, %v3277_v0  ;;  %v419_v28 = vld [vmem:[#allocation3 + $0x20] sm:$0x8]  ;;  %v461_v35 = vsel %vm4509_vm7, 0, %v460_v25  ;;  %vm4518_vm7 = vnez %v4419_v52 }
  0xcc   : > { %2845 = vmatprep.mubr.msk.bf16.mxu1 %vm4447_vm4, %v3277_v0  ;;  %v420_v58 = vsel %vm4510_vm8, 0, %v419_v28  ;;  %462 = vst [vmem:[#allocation3 + $0x20] sm:$0x10] %v461_v35  ;;  %vm4519_vm8 = vsmask.f32 7424 }
  0xcd   : > { %421 = vst [vmem:[#allocation3 + $0x20] sm:$0x8] %v420_v58 }
  0xd2   : > { %2722 = vmatmul.mubr.bf16.gmra.mrb[32].mxu0 %v735_v19 }
  0xd3   : > { %2793 = vmatprep.mubr.msk.bf16.mxu0 %vm4447_vm4, %v3277_v0 }
  0xda   : > { %2794 = vmatmul.mubr.bf16.vlgmr.msra.gmra.mrb[36].mxu0 %v1080_v40 }
  0xdb   : > { %2797 = vmatprep.mubr.msk.bf16.mxu0 %vm4447_vm4, %v3277_v0 }
  0xe2   : > { %2798 = vmatmul.mubr.bf16.gmra.mrb[40].mxu0 %v3812_v42  ;;  %v3093_v42 = vld [vmem:[#allocation9] sm:$0xff]  }
  0xe3   : > { %2801 = vmatprep.mubr.msk.bf16.mxu0 %vm4447_vm4, %v3277_v0  ;;  %2882 = vmatpush3.bf16.msra.mxu0 %v3093_v42 }
  0xe4   : > { %2883 = vmatprep.subr.bf16.mxu0 %v3277_v0 }
  0xea   : > { %2802 = vmatmul.mubr.bf16.gmra.mrb[44].mxu0 %v3815_v1  ;;  %v3092_v1 = vld [vmem:[#allocation9 + $0x50] sm:$0xff]  }
  0xeb   : > { %2805 = vmatprep.mubr.msk.bf16.mxu0 %vm4447_vm4, %v3277_v0  ;;  %2834 = vmatpush3.bf16.msra.mxu1 %v3092_v1 }
  0xec   : > { %2835 = vmatprep.subr.bf16.mxu1 %v3277_v0 }
  0xef   : > { %2836 = vmatpush3.bf16.msra.mxu1 %v3094_v18 }
  0xf0   : > { %2837 = vmatprep.subr.bf16.mxu1 %v3277_v0 }
  0xf2   : > { %2806 = vmatmul.mubr.bf16.gmra.mrb[48].mxu0 %v3824_v59  ;;  %v3095_v59 = vld [vmem:[#allocation9 + $0x8] sm:$0xff]  }
  0xf3   : > { %2809 = vmatprep.mubr.msk.bf16.mxu0 %vm4447_vm4, %v3277_v0  ;;  %2884 = vmatpush3.bf16.msra.mxu0 %v3095_v59 }
  0xf4   : > { %2885 = vmatprep.subr.bf16.mxu0 %v3277_v0  ;;  %2838 = vmatpush3.bf16.msra.mxu1 %v3097_v4 }
  0xf5   : > { %2839 = vmatprep.subr.bf16.mxu1 %v3277_v0 }
  0xf8   : > { %2840 = vmatpush3.bf16.msra.mxu1 %v3100_v30 }
  0xf9   : > { %2841 = vmatprep.subr.bf16.mxu1 %v3277_v0 }
  0xfa   : > { %2810 = vmatmul.mubr.bf16.gmra.mrb[52].mxu0 %v3838_v9  ;;  %v3096_v9 = vld [vmem:[#allocation9 + $0x10] sm:$0xff]  }
  0xfb   : > { %2813 = vmatprep.mubr.msk.bf16.mxu0 %vm4447_vm4, %v3277_v0  ;;  %2886 = vmatpush3.bf16.msra.mxu0 %v3096_v9 }
  0xfc   : > { %2887 = vmatprep.subr.bf16.mxu0 %v3277_v0  ;;  %2842 = vmatpush3.bf16.msra.mxu1 %v3103_v11 }
  0xfd   : > { %2843 = vmatprep.subr.bf16.mxu1 %v3277_v0 }
 0x100   : > { %2844 = vmatpush3.bf16.msra.mxu1 %v3105_v27  ;;  %v595_v27 = vld [vmem:[#allocation3 + $0x40] sm:$0x80] }
 0x101   : > { %2933 = vmatprep.subr.bf16.mxu1 %v3277_v0  ;;  %v596_v35 = vsel %vm3783_vm13, 0, %v595_v27 }
 0x102   : > { %2814 = vmatmul.mubr.bf16.gmra.mrb[56].mxu0 %v3848_v29  ;;  %v3098_v29 = vld [vmem:[#allocation9 + $0x18] sm:$0xff]   ;;  %597 = vst [vmem:[#allocation3 + $0x40] sm:$0x80] %v596_v35 }
 0x103   : > { %2817 = vmatprep.mubr.msk.bf16.mxu0 %vm4447_vm4, %v3277_v0  ;;  %2888 = vmatpush3.bf16.msra.mxu0 %v3098_v29  ;;  %v507_v29 = vld [vmem:[#allocation3 + $0x30] sm:$0x20] }
 0x104   : > { %2889 = vmatprep.subr.bf16.mxu0 %v3277_v0  ;;  %v508_v45 = vsel %vm3703_vm10, 0, %v507_v29  ;;  %vm4513_vm10 = vnez %v4479_v23 }
 0x105   : > { %509 = vst [vmem:[#allocation3 + $0x30] sm:$0x20] %v508_v45  ;;  %v552_v11 = vsel %vm4513_vm10, 0, %v551_v10  ;;  %vm4522_vm10 = vnez %v4434_v13 }
 0x106   : > { %553 = vst [vmem:[#allocation3 + $0x38] sm:$0x40] %v552_v11 }
 0x10a   : > { %2818 = vmatmul.mubr.bf16.gmra.mrb[60].mxu0 %v1092_v50  ;;  %v3101_v50 = vld [vmem:[#allocation9 + $0x28] sm:$0xff]  }
 0x10b   : > { %2821 = vmatprep.mubr.msk.bf16.mxu0 %vm4447_vm4, %v3277_v0 }
 0x112   : > { %2822 = vmatmul.mubr.bf16.gmra.mrb[64].mxu0 %v1094_v53  ;;  %v288_v53 = vsel %vm3518_vm5, 0, %v287_v44 }
 0x113   : > { %2825 = vmatprep.mubr.msk.bf16.mxu0 %vm4447_vm4, %v3277_v0  ;;  %289 = vst [vmem:[#allocation3] sm:$0x1] %v288_v53 }
 0x11a   : > { %2826 = vmatmul.mubr.bf16.gmra.mrb[68].mxu0 %v1093_v33  ;;  %v3099_v33 = vld [vmem:[#allocation9 + $0x20] sm:$0xff]  }
 0x11b   : > { %2897 = vmatprep.mubr.msk.bf16.mxu0 %vm4447_vm4, %v3277_v0  ;;  %2890 = vmatpush3.bf16.msra.mxu0 %v3099_v33 }
 0x11c   : > { %2891 = vmatprep.subr.bf16.mxu0 %v3277_v0 }
 0x11f   : > { %2892 = vmatpush3.bf16.msra.mxu0 %v3101_v50 }
 0x120   : > { %2893 = vmatprep.subr.bf16.mxu0 %v3277_v0 }
 0x123   : > { %2894 = vmatpush3.bf16.msra.mxu0 %v3102_v54  ;;  %v593_v54 = vsel %vm3758_vm3, 0, %v592_v26  ;;  %vm4514_vm3 = vnez %v4410_v32 }
 0x124   : > { %2895 = vmatprep.subr.bf16.mxu0 %v3277_v0  ;;  %594 = vst [vmem:[#allocation3 + $0x38] sm:$0x80] %v593_v54 }
 0x127   : > { %2896 = vmatpush3.bf16.msra.mxu0 %v3104_v56 }
 0x15e   : > { %v980_v19 = vpop.f32.mrb[0].mxu1 }
 0x15f   : > { %v2743_v40 = vpop.f32.mrb[1].mxu1 }
 0x160   : > { %v983_v16 = vpop.f32.mrb[2].mxu1 }
 0x161   : > { %v2744_v20 = vpop.f32.mrb[3].mxu1 }
 0x164   : > { %v827_v42 = vpop.f32.mrb[0].mxu0 }
 0x165   : > { %v3951_v59 = vadd.f32 %v980_v19, %v827_v42  ;;  %v2691_v9 = vpop.f32.mrb[1].mxu0 }
 0x166   : > { %v988_v1 = vpop.f32.mrb[4].mxu1  ;;  %v830_v33 = vpop.f32.mrb[2].mxu0 }
 0x167   : > { %v2747_v18 = vpop.f32.mrb[5].mxu1  ;;  %v3957_v46 = vadd.f32 %v983_v16, %v830_v33  ;;  %v2692_v50 = vpop.f32.mrb[3].mxu0 }
 0x168   : > { %v991_v44 = vpop.f32.mrb[6].mxu1 }
 0x169   : > { %v2748_v53 = vpop.f32.mrb[7].mxu1 }
 0x16d   : > { %v835_v56 = vpop.f32.mrb[4].mxu0 }
 0x16e   : > { %v996_v61 = vpop.f32.mrb[8].mxu1  ;;  %v3961_v3 = vadd.f32 %v988_v1, %v835_v56  ;;  %v2695_v63 = vpop.f32.mrb[5].mxu0 }
 0x16f   : > { %v2751_v4 = vpop.f32.mrb[9].mxu1  ;;  %v838_v6 = vpop.f32.mrb[6].mxu0 }
 0x170   : > { %v999_v5 = vpop.f32.mrb[10].mxu1  ;;  %v3963_v12 = vadd.f32 %v991_v44, %v838_v6  ;;  %v2696_v49 = vpop.f32.mrb[7].mxu0 }
 0x171   : > { %v2752_v30 = vpop.f32.mrb[11].mxu1 }
 0x175   : > { %v843_v48 = vpop.f32.mrb[8].mxu0 }
 0x176   : > { %v1004_v17 = vpop.f32.mrb[12].mxu1  ;;  %v3967_v22 = vadd.f32 %v996_v61, %v843_v48  ;;  %v2699_v21 = vpop.f32.mrb[9].mxu0 }
 0x177   : > { %v2755_v38 = vpop.f32.mrb[13].mxu1  ;;  %v846_v25 = vpop.f32.mrb[10].mxu0 }
 0x178   : > { %v1007_v28 = vpop.f32.mrb[14].mxu1  ;;  %v3971_v58 = vadd.f32 %v999_v5, %v846_v25  ;;  %v2700_v47 = vpop.f32.mrb[11].mxu0 }
 0x179   : > { %v2756_v19 = vpop.f32.mrb[15].mxu1 }
 0x17d   : > { %v851_v23 = vpop.f32.mrb[12].mxu0 }
 0x17e   : > { %v1012_v37 = vpop.f32.mrb[16].mxu1  ;;  %v3973_v39 = vadd.f32 %v1004_v17, %v851_v23  ;;  %v2703_v40 = vpop.f32.mrb[13].mxu0 }
 0x17f   : > { %v2759_v43 = vpop.f32.mrb[17].mxu1  ;;  %v854_v16 = vpop.f32.mrb[14].mxu0 }
 0x180   : > { %v1015_v20 = vpop.f32.mrb[18].mxu1  ;;  %v3975_v42 = vadd.f32 %v1007_v28, %v854_v16  ;;  %v2704_v1 = vpop.f32.mrb[15].mxu0 }
 0x181   : > { %v2760_v8 = vpop.f32.mrb[19].mxu1 }
 0x185   : > { %v859_v9 = vpop.f32.mrb[16].mxu0 }
 0x186   : > { %v1020_v18 = vpop.f32.mrb[20].mxu1  ;;  %v3977_v29 = vadd.f32 %v1012_v37, %v859_v9  ;;  %v2707_v33 = vpop.f32.mrb[17].mxu0 }
 0x187   : > { %v2763_v44 = vpop.f32.mrb[21].mxu1  ;;  %v862_v45 = vpop.f32.mrb[18].mxu0 }
 0x188   : > { %v1023_v31 = vpop.f32.mrb[22].mxu1  ;;  %v3979_v50 = vadd.f32 %v1015_v20, %v862_v45  ;;  %v2708_v53 = vpop.f32.mrb[19].mxu0 }
 0x189   : > { %v2764_v26 = vpop.f32.mrb[23].mxu1 }
 0x18d   : > { %v867_v54 = vpop.f32.mrb[20].mxu0 }
 0x18e   : > { %v1028_v56 = vpop.f32.mrb[24].mxu1  ;;  %v3981_v61 = vadd.f32 %v1020_v18, %v867_v54  ;;  %v2711_v63 = vpop.f32.mrb[21].mxu0  ;;  %v4000_v54 = vld [vmem:[%s4359_s2] ss:$0 sm:$0xff] }
 0x18f   : > { %v2767_v4 = vpop.f32.mrb[25].mxu1  ;;  %v870_v10 = vpop.f32.mrb[22].mxu0 }
 0x190   : > { %v1031_v6 = vpop.f32.mrb[26].mxu1  ;;  %v3983_v5 = vadd.f32 %v1023_v31, %v870_v10  ;;  %v2712_v49 = vpop.f32.mrb[23].mxu0 }
 0x191   : > { %v2768_v30 = vpop.f32.mrb[27].mxu1 }
 0x195   : > { %v875_v11 = vpop.f32.mrb[24].mxu0 }
 0x196   : > { %v1036_v48 = vpop.f32.mrb[28].mxu1  ;;  %v3985_v17 = vadd.f32 %v1028_v56, %v875_v11  ;;  %v2715_v21 = vpop.f32.mrb[25].mxu0 }
 0x197   : > { %v2771_v38 = vpop.f32.mrb[29].mxu1  ;;  %v878_v27 = vpop.f32.mrb[26].mxu0 }
 0x198   : > { %v1039_v25 = vpop.f32.mrb[30].mxu1  ;;  %v3987_v28 = vadd.f32 %v1031_v6, %v878_v27  ;;  %v2716_v35 = vpop.f32.mrb[27].mxu0 }
 0x199   : > { %v2772_v47 = vpop.f32.mrb[31].mxu1 }
 0x19d   : > { %v883_v19 = vpop.f32.mrb[28].mxu0 }
 0x19e   : > { %v1044_v23 = vpop.f32.mrb[32].mxu1  ;;  %v3989_v37 = vadd.f32 %v1036_v48, %v883_v19  ;;  %v2719_v40 = vpop.f32.mrb[29].mxu0 }
 0x19f   : > { %v2775_v43 = vpop.f32.mrb[33].mxu1  ;;  %v886_v16 = vpop.f32.mrb[30].mxu0  ;;  %v1339_v40 = vld [vmem:[#allocation3 + $0x8] sm:$0x1] }
 0x1a0   : > { %v1047_v20 = vpop.f32.mrb[34].mxu1  ;;  %v3991_v1 = vadd.f32 %v1039_v25, %v886_v16  ;;  %v2720_v8 = vpop.f32.mrb[31].mxu0 }
 0x1a1   : > { %v2776_v9 = vpop.f32.mrb[35].mxu1 }
 0x1a5   : > { %v891_v18 = vpop.f32.mrb[32].mxu0 }
 0x1a6   : > { %v3993_v33 = vadd.f32 %v1044_v23, %v891_v18  ;;  %v2723_v44 = vpop.f32.mrb[33].mxu0 }
 0x1a7   : > { %v894_v45 = vpop.f32.mrb[34].mxu0 }
 0x1a8   : > { %v3995_v31 = vadd.f32 %v1047_v20, %v894_v45  ;;  %v2724_v53 = vpop.f32.mrb[35].mxu0  ;;  %v1336_v20 = vld [vmem:[#allocation3] sm:$0xff] }
 0x1ad   : > { %v1186_v26 = vpop.f32.mrb[36].mxu0 }
 0x1ae   : > { %v1257_v56 = vadd.f32 %v1186_v26, %v3951_v59  ;;  %v2795_v63 = vpop.f32.mrb[37].mxu0 }
 0x1af   : > { %v1189_v4 = vpop.f32.mrb[38].mxu0 }
 0x1b0   : > { %v1282_v10 = vadd.f32 %v4000_v54, %v1257_v56  ;;  %v1258_v6 = vadd.f32 %v1189_v4, %v3957_v46  ;;  %v2796_v49 = vpop.f32.mrb[39].mxu0 }
 0x1b2   : > { %v1283_v30 = vadd.f32 %v4000_v54, %v1258_v6  ;;  %v1300_v11 = vmax.f32 %v1282_v10, 0.0 }
 0x1b4   : > { %v1301_v48 = vmax.f32 %v1283_v30, 0.0  ;;  %v1359_v30 = vld [vmem:[#allocation3 + $0x8] sm:$0xfe] }
 0x1b5   : > { %v1194_v21 = vpop.f32.mrb[40].mxu0 }
 0x1b6   : > { %v1318_v38 = vpack.c.bf16 %v1301_v48, %v1300_v11  ;;  %v1259_v27 = vadd.f32 %v1194_v21, %v3961_v3  ;;  %v2799_v25 = vpop.f32.mrb[41].mxu0 }
 0x1b7   : > { %v1197_v35 = vpop.f32.mrb[42].mxu0 }
 0x1b8   : > { %v1328_v47 = vshrl.u32 %v1318_v38, 16  ;;  %v1284_v59 = vadd.f32 %v4000_v54, %v1259_v27  ;;  %v1260_v19 = vadd.f32 %v1197_v35, %v3963_v12  ;;  %v2800_v23 = vpop.f32.mrb[43].mxu0  ;;  %v1331_v46 = vshll.u32 %v1318_v38, 16 }
 0x1ba   : > { %v1330_v43 = vrot.slane %v1328_v47, 7  ;;  %v1285_v16 = vadd.f32 %v4000_v54, %v1260_v19  ;;  %v1302_v18 = vmax.f32 %v1284_v59, 0.0 }
 0x1bc   : > { %v1333_v8 = vor.u32 %v1331_v46, %v1330_v43  ;;  %v1340_v9 = vsel %vm3518_vm5, %v1330_v43, %v1339_v40  ;;  %v1303_v3 = vmax.f32 %v1285_v16, 0.0  ;;  %vm4515_vm5 = vnez %v4414_v41 }
 0x1bd   : > { %1341 = vst [vmem:[#allocation3 + $0x8] sm:$0x1] %v1340_v9  ;;  %v1202_v44 = vpop.f32.mrb[44].mxu0 }
 0x1be   : > { %v1337_v45 = vsel %vm4514_vm3, %v1333_v8, %v1336_v20  ;;  %v1319_v53 = vpack.c.bf16 %v1303_v3, %v1302_v18  ;;  %v1261_v12 = vadd.f32 %v1202_v44, %v3967_v22  ;;  %v2803_v26 = vpop.f32.mrb[45].mxu0  ;;  %v1375_v20 = vld [vmem:[#allocation3 + $0x10] sm:$0xfc]  ;;  %v1362_v8 = vld [vmem:[#allocation3 + $0x10] sm:$0x3]  ;;  %vm4523_vm3 = vmmov %vm4519_vm8 }
 0x1bf   : > { %1338 = vst [vmem:[#allocation3] sm:$0xff] %v1337_v45  ;;  %v1205_v56 = vpop.f32.mrb[46].mxu0  ;;  %2898 = vmatmul.mubr.bf16.vlgmr.msra.gmra.mrb[72].mxu0 %v1337_v45  ;;  %v1507_v40 = vshll.u32 %v1337_v45, 16 }
 0x1c0   : > { %v1343_v63 = vshrl.u32 %v1319_v53, 16  ;;  %v1286_v4 = vadd.f32 %v4000_v54, %v1261_v12  ;;  %v1262_v7 = vadd.f32 %v1205_v56, %v3971_v58  ;;  %v2804_v10 = vpop.f32.mrb[47].mxu0  ;;  %2901 = vmatprep.mubr.msk.bf16.mxu0 %vm4447_vm4, %v3277_v0  ;;  %v1346_v49 = vshll.u32 %v1319_v53, 16 }
 0x1c2   : > { %v1345_v6 = vrot.slane %v1343_v63, 7  ;;  %v1287_v32 = vadd.f32 %v4000_v54, %v1262_v7  ;;  %v1304_v22 = vmax.f32 %v1286_v4, 0.0  ;;  %v1505_v4 = vshrl.u32 %v1337_v45, 16 }
 0x1c4   : > { %v1348_v11 = vor.u32 %v1346_v49, %v1345_v6  ;;  %v1305_v48 = vmax.f32 %v1287_v32, 0.0 }
 0x1c5   : > { %v1210_v21 = vpop.f32.mrb[48].mxu0 }
 0x1c6   : > { %v1360_v38 = vsel %vm4515_vm5, %v1348_v11, %v1359_v30  ;;  %v1320_v27 = vpack.c.bf16 %v1305_v48, %v1304_v22  ;;  %v1263_v25 = vadd.f32 %v1210_v21, %v3973_v39  ;;  %v2807_v58 = vpop.f32.mrb[49].mxu0  ;;  %v1509_v39 = vrot.slane %v1507_v40, 1  ;;  %v3106_v30 = vld [vmem:[#allocation9 + $0x80] sm:$0xff]   ;;  %v1391_v48 = vld [vmem:[#allocation3 + $0x18] sm:$0xf8]  ;;  %vm4524_vm5 = vmmov %vm4520_vm9 }
 0x1c7   : > { %1361 = vst [vmem:[#allocation3 + $0x8] sm:$0xfe] %v1360_v38  ;;  %v1213_v35 = vpop.f32.mrb[50].mxu0 }
 0x1c8   : > { %v1350_v47 = vshrl.u32 %v1320_v27, 16  ;;  %v1288_v59 = vadd.f32 %v4000_v54, %v1263_v25  ;;  %v1264_v19 = vadd.f32 %v1213_v35, %v3975_v42  ;;  %v2808_v23 = vpop.f32.mrb[51].mxu0  ;;  %v1353_v46 = vshll.u32 %v1320_v27, 16  ;;  %v1378_v27 = vld [vmem:[#allocation3 + $0x18] sm:$0x7]  ;;  %v3107_v35 = vld [vmem:[#allocation9 + $0x88] sm:$0xff]  }
 0x1c9   : > { %v1510_v32 = vor.u32 %v1509_v39, %v1505_v4  ;;  %v1394_v4 = vld [vmem:[#allocation3 + $0x20] sm:$0xf] }
 0x1ca   : > { %v1352_v43 = vrot.slane %v1350_v47, 7  ;;  %v1289_v16 = vadd.f32 %v4000_v54, %v1264_v19  ;;  %v1306_v9 = vmax.f32 %v1288_v59, 0.0 }
 0x1cc   : > { %v1355_v41 = vor.u32 %v1353_v46, %v1352_v43  ;;  %v1307_v18 = vmax.f32 %v1289_v16, 0.0 }
 0x1cd   : > { %v1218_v3 = vpop.f32.mrb[52].mxu0 }
 0x1ce   : > { %v1356_v44 = vsel %vm4516_vm15, %v1345_v6, %v1355_v41  ;;  %v1376_v53 = vsel %vm4517_vm0, %v1355_v41, %v1375_v20  ;;  %v1321_v12 = vpack.c.bf16 %v1307_v18, %v1306_v9  ;;  %v1265_v42 = vadd.f32 %v1218_v3, %v3977_v29  ;;  %v2811_v26 = vpop.f32.mrb[53].mxu0  ;;  %v4030_v56 = vld [vmem:[#allocation3 + $0x8] sm:$0xff]  ;;  %v3108_v18 = vld [vmem:[#allocation9 + $0x90] sm:$0xff]  }
 0x1cf   : > { %v1363_v63 = vsel %vm4518_vm7, %v1356_v44, %v1362_v8  ;;  %1377 = vst [vmem:[#allocation3 + $0x10] sm:$0xfc] %v1376_v53  ;;  %v1221_v7 = vpop.f32.mrb[54].mxu0  ;;  %v1512_v10 = vshll.u32 %v4030_v56, 16  ;;  %2902 = vmatmul.mubr.bf16.gmra.mrb[76].mxu0 %v4030_v56  ;;  %v1918_v9 = vrot.slane %v4030_v56, 1  ;;  %vm4525_vm15 = vnez %v4459_v51  ;;  %vm4527_vm7 = vmmov %vm4523_vm3 }
 0x1d0   : > { %1364 = vst [vmem:[#allocation3 + $0x10] sm:$0x3] %v1363_v63  ;;  %v1366_v6 = vshrl.u32 %v1321_v12, 16  ;;  %v1290_v62 = vadd.f32 %v4000_v54, %v1265_v42  ;;  %v1266_v49 = vadd.f32 %v1221_v7, %v3979_v50  ;;  %v2812_v29 = vpop.f32.mrb[55].mxu0  ;;  %2905 = vmatprep.mubr.msk.bf16.mxu0 %vm4447_vm4, %v3277_v0  ;;  %v1369_v45 = vshll.u32 %v1321_v12, 16 }
 0x1d1   : > { %v1514_v52 = vrot.slane %v1512_v10, 1  ;;  %v1407_v53 = vld [vmem:[#allocation3 + $0x20] sm:$0xf0]  ;;  %vm4526_vm0 = vnez %v4451_v36 }
 0x1d2   : > { %v1368_v11 = vrot.slane %v1366_v6, 7  ;;  %v1291_v22 = vadd.f32 %v4000_v54, %v1266_v49  ;;  %v1308_v25 = vmax.f32 %v1290_v62, 0.0  ;;  %v3109_v49 = vld [vmem:[#allocation9 + $0x98] sm:$0xff]  }
 0x1d3   : > { %v1515_v21 = vsel %vm4519_vm8, %v1510_v32, %v1514_v52  ;;  %vm4528_vm8 = vmmov %vm4524_vm5 }
 0x1d4   : > { %v1371_v38 = vor.u32 %v1369_v45, %v1368_v11  ;;  %v1309_v58 = vmax.f32 %v1291_v22, 0.0  ;;  %2846 = vmatmul.mubr.bf16.vlgmr.msra.gmra.mrb[36].mxu1 %v1515_v21 }
 0x1d5   : > { %v1226_v50 = vpop.f32.mrb[56].mxu0  ;;  %2934 = vmatpush3.bf16.msra.mxu1 %v3106_v30  ;;  %2849 = vmatprep.mubr.msk.bf16.mxu1 %vm4447_vm4, %v3277_v0 }
 0x1d6   : > { %v1372_v47 = vsel %vm4520_vm9, %v1352_v43, %v1371_v38  ;;  %v1392_v59 = vsel %vm4521_vm12, %v1371_v38, %v1391_v48  ;;  %v1322_v19 = vpack.c.bf16 %v1309_v58, %v1308_v25  ;;  %v1267_v23 = vadd.f32 %v1226_v50, %v3981_v61  ;;  %v2815_v40 = vpop.f32.mrb[57].mxu0  ;;  %2935 = vmatprep.subr.bf16.mxu1 %v3277_v0  ;;  %v3110_v25 = vld [vmem:[#allocation9 + $0xa0] sm:$0xff]  }
 0x1d7   : > { %v1379_v46 = vsel %vm4522_vm10, %v1372_v47, %v1378_v27  ;;  %1393 = vst [vmem:[#allocation3 + $0x18] sm:$0xf8] %v1392_v59  ;;  %v1229_v16 = vpop.f32.mrb[58].mxu0  ;;  %v4051_v20 = vld [vmem:[#allocation3 + $0x10] sm:$0xff]  ;;  %v1516_v61 = vshrl.u32 %v4030_v56, 16  ;;  %vm4529_vm9 = vnez %v4475_v15  ;;  %vm4530_vm12 = vnez %v4463_v55  ;;  %vm4531_vm10 = vmmov %vm4523_vm3 }
 0x1d8   : > { %1380 = vst [vmem:[#allocation3 + $0x18] sm:$0x7] %v1379_v46  ;;  %v1382_v41 = vshrl.u32 %v1322_v19, 16  ;;  %v1292_v43 = vadd.f32 %v4000_v54, %v1267_v23  ;;  %v1268_v24 = vadd.f32 %v1229_v16, %v3983_v5  ;;  %v2816_v8 = vpop.f32.mrb[59].mxu0  ;;  %2906 = vmatmul.mubr.bf16.gmra.mrb[80].mxu0 %v4051_v20  ;;  %v1520_v13 = vshll.u32 %v4051_v20, 16 }
 0x1d9   : > { %2909 = vmatprep.mubr.msk.bf16.mxu0 %vm4447_vm4, %v3277_v0  ;;  %2936 = vmatpush3.bf16.msra.mxu1 %v3107_v35  ;;  %v1920_v39 = vrot.slane %v4051_v20, 1  ;;  %v1385_v44 = vshll.u32 %v1322_v19, 16  ;;  %v1518_v12 = vor.u32 %v1516_v61, %v1514_v52  ;;  %v1524_v36 = vshrl.u32 %v4051_v20, 16  ;;  %v1410_v46 = vld [vmem:[#allocation3 + $0x28] sm:$0x1f] }
 0x1da   : > { %v1384_v3 = vrot.slane %v1382_v41, 7  ;;  %v1293_v5 = vadd.f32 %v4000_v54, %v1268_v24  ;;  %2937 = vmatprep.subr.bf16.mxu1 %v3277_v0  ;;  %v1522_v42 = vrot.slane %v1520_v13, 1  ;;  %v1310_v7 = vmax.f32 %v1292_v43, 0.0  ;;  %v3111_v24 = vld [vmem:[#allocation9 + $0xa8] sm:$0xff]  }
 0x1db   : > { %v4067_v26 = vsel %vm576_vm2, %v1918_v9, %v1920_v39 }
 0x1dc   : > { %v1387_v63 = vor.u32 %v1385_v44, %v1384_v3  ;;  %v1311_v10 = vmax.f32 %v1293_v5, 0.0  ;;  %v1523_v62 = vsel %vm4523_vm3, %v1518_v12, %v1522_v42  ;;  %v1526_v59 = vor.u32 %v1524_v36, %v1522_v42  ;;  %vm4532_vm3 = vmmov %vm4524_vm5 }
 0x1dd   : > { %v1234_v6 = vpop.f32.mrb[60].mxu0  ;;  %2938 = vmatpush3.bf16.msra.mxu1 %v3108_v18 }
 0x1de   : > { %v1388_v29 = vsel %vm4524_vm5, %v1368_v11, %v1387_v63  ;;  %v1408_v32 = vsel %vm4525_vm15, %v1387_v63, %v1407_v53  ;;  %v1323_v52 = vpack.c.bf16 %v1311_v10, %v1310_v7  ;;  %v1269_v30 = vadd.f32 %v1234_v6, %v3985_v17  ;;  %2850 = vmatmul.mubr.bf16.gmra.mrb[40].mxu1 %v1523_v62  ;;  %v2819_v45 = vpop.f32.mrb[61].mxu0  ;;  %v3112_v63 = vld [vmem:[#allocation9 + $0xb0] sm:$0xff]  }
 0x1df   : > { %v1395_v22 = vsel %vm4526_vm0, %v1388_v29, %v1394_v4  ;;  %1409 = vst [vmem:[#allocation3 + $0x20] sm:$0xf0] %v1408_v32  ;;  %v1237_v48 = vpop.f32.mrb[62].mxu0  ;;  %v4076_v21 = vld [vmem:[#allocation3 + $0x18] sm:$0xff]  ;;  %2853 = vmatprep.mubr.msk.bf16.mxu1 %vm4447_vm4, %v3277_v0  ;;  %2939 = vmatprep.subr.bf16.mxu1 %v3277_v0  ;;  %vm4541_vm15 = vcmask 1045504  }
 0x1e0   : > { %1396 = vst [vmem:[#allocation3 + $0x20] sm:$0xf] %v1395_v22  ;;  %v1398_v51 = vshrl.u32 %v1323_v52, 16  ;;  %v1294_v11 = vadd.f32 %v4000_v54, %v1269_v30  ;;  %v1270_v17 = vadd.f32 %v1237_v48, %v3987_v28  ;;  %v2820_v38 = vpop.f32.mrb[63].mxu0  ;;  %2910 = vmatmul.mubr.bf16.gmra.mrb[84].mxu0 %v4076_v21  ;;  %v1528_v27 = vshll.u32 %v4076_v21, 16 }
 0x1e1   : > { %2913 = vmatprep.mubr.msk.bf16.mxu0 %vm4447_vm4, %v3277_v0  ;;  %2940 = vmatpush3.bf16.msra.mxu1 %v3109_v49  ;;  %v1922_v58 = vrot.slane %v4076_v21, 1  ;;  %v1401_v35 = vshll.u32 %v1323_v52, 16  ;;  %v1423_v28 = vld [vmem:[#allocation3 + $0x28] sm:$0xe0]  ;;  %v1532_v55 = vshrl.u32 %v4076_v21, 16  ;;  %v3113_v21 = vld [vmem:[#allocation9 + $0xb8] sm:$0xff]  }
 0x1e2   : > { %v1400_v50 = vrot.slane %v1398_v51, 7  ;;  %v1295_v47 = vadd.f32 %v4000_v54, %v1270_v17  ;;  %2941 = vmatprep.subr.bf16.mxu1 %v3277_v0  ;;  %v1530_v19 = vrot.slane %v1528_v27, 1  ;;  %v1312_v16 = vmax.f32 %v1294_v11, 0.0  ;;  %v1426_v52 = vld [vmem:[#allocation3 + $0x30] sm:$0x3f] }
 0x1e3   : > { %v4092_v23 = vsel %vm576_vm2, %v1920_v39, %v1922_v58 }
 0x1e4   : > { %v1403_v40 = vor.u32 %v1401_v35, %v1400_v50  ;;  %v1313_v20 = vmax.f32 %v1295_v47, 0.0  ;;  %v1531_v43 = vsel %vm4527_vm7, %v1526_v59, %v1530_v19  ;;  %v1534_v62 = vor.u32 %v1532_v55, %v1530_v19 }
 0x1e5   : > { %v1242_v41 = vpop.f32.mrb[64].mxu0  ;;  %2942 = vmatpush3.bf16.msra.mxu1 %v3110_v25  ;;  %v1455_v25 = vld [vmem:[#allocation3 + $0x38] sm:$0x80] }
 0x1e6   : > { %v1404_v8 = vsel %vm4528_vm8, %v1384_v3, %v1403_v40  ;;  %v1424_v61 = vsel %vm4529_vm9, %v1403_v40, %v1423_v28  ;;  %v1324_v13 = vpack.c.bf16 %v1313_v20, %v1312_v16  ;;  %v1271_v18 = vadd.f32 %v1242_v41, %v3989_v37  ;;  %2854 = vmatmul.mubr.bf16.gmra.mrb[44].mxu1 %v1531_v43  ;;  %v2823_v39 = vpop.f32.mrb[65].mxu0  ;;  %vm4544_vm8 = vmmov %vm4541_vm15 }
 0x1e7   : > { %v1411_v44 = vsel %vm4530_vm12, %v1404_v8, %v1410_v46  ;;  %1425 = vst [vmem:[#allocation3 + $0x28] sm:$0xe0] %v1424_v61  ;;  %v1245_v5 = vpop.f32.mrb[66].mxu0  ;;  %v4101_v53 = vld [vmem:[#allocation3 + $0x20] sm:$0xff]  ;;  %2857 = vmatprep.mubr.msk.bf16.mxu1 %vm4447_vm4, %v3277_v0  ;;  %2943 = vmatprep.subr.bf16.mxu1 %v3277_v0 }
 0x1e8   : > { %1412 = vst [vmem:[#allocation3 + $0x28] sm:$0x1f] %v1411_v44  ;;  %v1414_v15 = vshrl.u32 %v1324_v13, 16  ;;  %v1296_v3 = vadd.f32 %v4000_v54, %v1271_v18  ;;  %v1272_v37 = vadd.f32 %v1245_v5, %v3991_v1  ;;  %v2824_v12 = vpop.f32.mrb[67].mxu0  ;;  %2914 = vmatmul.mubr.bf16.gmra.mrb[88].mxu0 %v4101_v53  ;;  %v1536_v42 = vshll.u32 %v4101_v53, 16 }
 0x1e9   : > { %2917 = vmatprep.mubr.msk.bf16.mxu0 %vm4447_vm4, %v3277_v0  ;;  %2944 = vmatpush3.bf16.msra.mxu1 %v3111_v24  ;;  %v1924_v4 = vrot.slane %v4101_v53, 1  ;;  %v1417_v10 = vshll.u32 %v1324_v13, 16  ;;  %v1439_v1 = vld [vmem:[#allocation3 + $0x30] sm:$0xc0]  ;;  %v1540_v57 = vshrl.u32 %v4101_v53, 16 }
 0x1ea   : > { %v1416_v7 = vrot.slane %v1414_v15, 7  ;;  %v1297_v6 = vadd.f32 %v4000_v54, %v1272_v37  ;;  %2945 = vmatprep.subr.bf16.mxu1 %v3277_v0  ;;  %v1538_v49 = vrot.slane %v1536_v42, 1  ;;  %v1314_v30 = vmax.f32 %v1296_v3, 0.0  ;;  %v1442_v24 = vld [vmem:[#allocation3 + $0x38] sm:$0x7f] }
 0x1eb   : > { %v4117_v29 = vsel %vm576_vm2, %v1922_v58, %v1924_v4 }
 0x1ec   : > { %v1419_v32 = vor.u32 %v1417_v10, %v1416_v7  ;;  %v1315_v45 = vmax.f32 %v1297_v6, 0.0  ;;  %v1539_v48 = vsel %vm4531_vm10, %v1534_v62, %v1538_v49  ;;  %v1542_v20 = vor.u32 %v1540_v57, %v1538_v49 }
 0x1ed   : > { %v1250_v22 = vpop.f32.mrb[68].mxu0  ;;  %2946 = vmatpush3.bf16.msra.mxu1 %v3112_v63  ;;  %v1458_v63 = vld [vmem:[#allocation3 + $0x40] sm:$0xff] }
 0x1ee   : > { %v1420_v51 = vsel %vm4532_vm3, %v1400_v50, %v1419_v32  ;;  %v1440_v11 = vsel %vm3776_vm14, %v1419_v32, %v1439_v1  ;;  %v1325_v17 = vpack.c.bf16 %v1315_v45, %v1314_v30  ;;  %v1273_v38 = vadd.f32 %v1250_v22, %v3993_v33  ;;  %2858 = vmatmul.mubr.bf16.gmra.mrb[48].mxu1 %v1539_v48  ;;  %v2827_v36 = vpop.f32.mrb[69].mxu0  ;;  %vm4533_vm14 = vmmov %vm4527_vm7 }
 0x1ef   : > { %v1427_v27 = vsel %vm3770_vm11, %v1420_v51, %v1426_v52  ;;  %1441 = vst [vmem:[#allocation3 + $0x30] sm:$0xc0] %v1440_v11  ;;  %v1253_v58 = vpop.f32.mrb[70].mxu0  ;;  %v1466_v35 = vld [vmem:[#allocation3 + $0x28] sm:$0xff]  ;;  %2861 = vmatprep.mubr.msk.bf16.mxu1 %vm4447_vm4, %v3277_v0  ;;  %2947 = vmatprep.subr.bf16.mxu1 %v3277_v0  ;;  %vm4534_vm11 = vmmov %vm4532_vm3 }
 0x1f0   : > { %1428 = vst [vmem:[#allocation3 + $0x30] sm:$0x3f] %v1427_v27  ;;  %v1430_v2 = vshrl.u32 %v1325_v17, 16  ;;  %v1433_v50 = vshll.u32 %v1325_v17, 16  ;;  %v1298_v47 = vadd.f32 %v4000_v54, %v1273_v38  ;;  %v1274_v33 = vadd.f32 %v1253_v58, %v3995_v31  ;;  %v2828_v28 = vpop.f32.mrb[71].mxu0  ;;  %2918 = vmatmul.mubr.bf16.gmra.mrb[92].mxu0 %v1466_v35 }
 0x1f1   : > { %v1544_v59 = vshll.u32 %v1466_v35, 16  ;;  %2921 = vmatprep.mubr.msk.bf16.mxu0 %vm4447_vm4, %v3277_v0  ;;  %2948 = vmatpush3.bf16.msra.mxu1 %v3113_v21  ;;  %v1926_v19 = vrot.slane %v1466_v35, 1  ;;  %v1548_v5 = vshrl.u32 %v1466_v35, 16 }
 0x1f2   : > { %v1432_v40 = vrot.slane %v1430_v2, 7  ;;  %v1456_v46 = vsel %vm3783_vm13, %v1433_v50, %v1455_v25  ;;  %v1299_v16 = vadd.f32 %v4000_v54, %v1274_v33  ;;  %v1316_v8 = vmax.f32 %v1298_v47, 0.0  ;;  %vm4535_vm13 = vmmov %vm4527_vm7  ;;  %v1890_v25 = vld [vmem:[#allocation3] sm:$0xfe] }
 0x1f3   : > { %1457 = vst [vmem:[#allocation3 + $0x38] sm:$0x80] %v1456_v46  ;;  %v1546_v41 = vrot.slane %v1544_v59, 1  ;;  %v4138_v31 = vsel %vm576_vm2, %v1924_v4, %v1926_v19  ;;  %v1917_v58 = vrot.slane %v1890_v25, 1 }
 0x1f4   : > { %v1435_v43 = vor.u32 %v1433_v50, %v1432_v40  ;;  %v1317_v61 = vmax.f32 %v1299_v16, 0.0 }
 0x1f5   : > { %v1547_v13 = vsel %vm4533_vm14, %v1542_v20, %v1546_v41  ;;  %v1550_v12 = vor.u32 %v1548_v5, %v1546_v41  ;;  %v1919_v35 = vsel %vm576_vm2, %v1917_v58, %v1918_v9 }
 0x1f6   : > { %v1436_v18 = vsel %vm4534_vm11, %v1416_v7, %v1435_v43  ;;  %v1326_v39 = vpack.c.bf16 %v1317_v61, %v1316_v8  ;;  %2862 = vmatmul.mubr.bf16.gmra.mrb[52].mxu1 %v1547_v13 }
 0x1f7   : > { %v1443_v14 = vsel %vm3804_vm6, %v1436_v18, %v1442_v24  ;;  %v1467_v54 = vld [vmem:[#allocation3 + $0x30] sm:$0xff]  ;;  %2865 = vmatprep.mubr.msk.bf16.mxu1 %vm4447_vm4, %v3277_v0  ;;  %vm4536_vm6 = vmmov %vm4532_vm3 }
 0x1f8   : > { %1444 = vst [vmem:[#allocation3 + $0x38] sm:$0x7f] %v1443_v14  ;;  %v1446_v44 = vshrl.u32 %v1326_v39, 16  ;;  %2922 = vmatmul.mubr.bf16.gmra.mrb[96].mxu0 %v1467_v54  ;;  %v1552_v53 = vshll.u32 %v1467_v54, 16  ;;  %v1928_v15 = vrot.slane %v1467_v54, 1  ;;  %v1449_v37 = vshll.u32 %v1326_v39, 16 }
 0x1f9   : > { %2925 = vmatprep.mubr.msk.bf16.mxu0 %vm4447_vm4, %v3277_v0  ;;  %v1556_v1 = vshrl.u32 %v1467_v54, 16 }
 0x1fa   : > { %v1448_v3 = vrot.slane %v1446_v44, 7  ;;  %v1554_v55 = vrot.slane %v1552_v53, 1  ;;  %v1929_v34 = vsel %vm576_vm2, %v1926_v19, %v1928_v15 }
 0x1fc   : > { %v1451_v42 = vor.u32 %v1449_v37, %v1448_v3  ;;  %v1555_v4 = vsel %vm4535_vm13, %v1550_v12, %v1554_v55  ;;  %v1558_v52 = vor.u32 %v1556_v1, %v1554_v55 }
 0x1fe   : > { %v1452_v7 = vsel %vm4536_vm6, %v1432_v40, %v1451_v42  ;;  %2866 = vmatmul.mubr.bf16.gmra.mrb[56].mxu1 %v1555_v4 }
 0x1ff   : > { %v1459_v10 = vsel %vm3828_vm1, %v1452_v7, %v1458_v63  ;;  %v1468_v6 = vld [vmem:[#allocation3 + $0x38] sm:$0xff]  ;;  %2869 = vmatprep.mubr.msk.bf16.mxu1 %vm4447_vm4, %v3277_v0  ;;  %vm4537_vm1 = vmmov %vm4527_vm7 }
 0x200   : > { %1460 = vst [vmem:[#allocation3 + $0x40] sm:$0xff] %v1459_v10  ;;  %2926 = vmatmul.mubr.bf16.gmra.mrb[100].mxu0 %v1468_v6  ;;  %v1560_v62 = vshll.u32 %v1468_v6, 16  ;;  %v1930_v49 = vrot.slane %v1468_v6, 1  ;;  %v1932_v32 = vrot.slane %v1459_v10, 1  ;;  %v1564_v48 = vshrl.u32 %v1468_v6, 16  ;;  %vm4538_vm5 = vmmov %vm4537_vm1 }
 0x201   : > { %2929 = vmatprep.mubr.msk.bf16.mxu0 %vm4447_vm4, %v3277_v0  ;;  %v1568_v51 = vshll.u32 %v1459_v10, 16  ;;  %v1572_v36 = vshrl.u32 %v1459_v10, 16 }
 0x202   : > { %v1562_v30 = vrot.slane %v1560_v62, 1  ;;  %v1931_v45 = vsel %vm576_vm2, %v1928_v15, %v1930_v49  ;;  %v1933_v60 = vsel %vm576_vm2, %v1930_v49, %v1932_v32  ;;  %vm4540_vm2 = vcmask 1043456  }
 0x203   : > { %v1570_v17 = vrot.slane %v1568_v51, 1  ;;  %vm4543_vm7 = vmmov %vm4540_vm2 }
 0x204   : > { %v1563_v22 = vsel %vm4537_vm1, %v1558_v52, %v1562_v30  ;;  %v1566_v11 = vor.u32 %v1564_v48, %v1562_v30 }
 0x205   : > { %v1574_v27 = vor.u32 %v1572_v36, %v1570_v17 }
 0x206   : > { %2870 = vmatmul.mubr.bf16.gmra.mrb[60].mxu1 %v1563_v22  ;;  %v1571_v38 = vsel %vm4538_vm5, %v1566_v11, %v1570_v17 }
 0x207   : > { %v1469_v21 = vld [vmem:[#allocation3 + $0x40] sm:$0x7f]  ;;  %2873 = vmatprep.mubr.msk.bf16.mxu1 %vm4447_vm4, %v3277_v0 }
 0x208   : > { %2930 = vmatmul.mubr.bf16.gmra.mrb[104].mxu0 %v1469_v21 }
 0x20e   : > { %2874 = vmatmul.mubr.bf16.gmra.mrb[64].mxu1 %v1571_v38 }
 0x20f   : > { %2877 = vmatprep.mubr.msk.bf16.mxu1 %vm4447_vm4, %v3277_v0 }
 0x216   : > { %2878 = vmatmul.mubr.bf16.gmra.mrb[68].mxu1 %v1574_v27 }
 0x217   : > { %2949 = vmatprep.mubr.msk.bf16.mxu1 %vm4447_vm4, %v3277_v0 }
 0x21e   : > { %2950 = vmatmul.mubr.bf16.vlgmr.msra.gmra.mrb[72].mxu1 %v1919_v35 }
 0x21f   : > { %2953 = vmatprep.mubr.msk.bf16.mxu1 %vm4447_vm4, %v3277_v0 }
 0x226   : > { %2954 = vmatmul.mubr.bf16.gmra.mrb[76].mxu1 %v4067_v26 }
 0x227   : > { %2957 = vmatprep.mubr.msk.bf16.mxu1 %vm4447_vm4, %v3277_v0 }
 0x22e   : > { %2958 = vmatmul.mubr.bf16.gmra.mrb[80].mxu1 %v4092_v23 }
 0x22f   : > { %2961 = vmatprep.mubr.msk.bf16.mxu1 %vm4447_vm4, %v3277_v0 }
 0x236   : > { %2962 = vmatmul.mubr.bf16.gmra.mrb[84].mxu1 %v4117_v29 }
 0x237   : > { %2965 = vmatprep.mubr.msk.bf16.mxu1 %vm4447_vm4, %v3277_v0 }
 0x23e   : > { %2966 = vmatmul.mubr.bf16.gmra.mrb[88].mxu1 %v4138_v31 }
 0x23f   : > { %2969 = vmatprep.mubr.msk.bf16.mxu1 %vm4447_vm4, %v3277_v0 }
 0x246   : > { %2970 = vmatmul.mubr.bf16.gmra.mrb[92].mxu1 %v1929_v34 }
 0x247   : > { %2973 = vmatprep.mubr.msk.bf16.mxu1 %vm4447_vm4, %v3277_v0 }
 0x24e   : > { %2974 = vmatmul.mubr.bf16.gmra.mrb[96].mxu1 %v1931_v45 }
 0x24f   : > { %2977 = vmatprep.mubr.msk.bf16.mxu1 %vm4447_vm4, %v3277_v0 }
 0x256   : > { %2978 = vmatmul.mubr.bf16.gmra.mrb[100].mxu1 %v1933_v60 }
 0x257   : > { %2981 = vmatprep.mubr.msk.bf16.mxu1 %vm4447_vm4, %v3277_v0  ;;  %vm4539_vm4 = vcmask 1041408  }
 0x258   : > { %vm4542_vm0 = vmmov %vm4539_vm4 }
 0x25e   : > { %2982 = vmatmul.mubr.bf16.gmra.mrb[104].mxu1 %v1932_v32 }
 0x292   : > { %v1819_v56 = vpop.f32.mrb[72].mxu0 }
 0x293   : > { %v2899_v9 = vpop.f32.mrb[73].mxu0 }
 0x294   : > { %v1822_v26 = vpop.f32.mrb[74].mxu0 }
 0x295   : > { %v2900_v23 = vpop.f32.mrb[75].mxu0 }
 0x2a2   : > { %v1827_v29 = vpop.f32.mrb[76].mxu0 }
 0x2a3   : > { %v2903_v2 = vpop.f32.mrb[77].mxu0 }
 0x2a4   : > { %v1830_v50 = vpop.f32.mrb[78].mxu0 }
 0x2a5   : > { %v2904_v47 = vpop.f32.mrb[79].mxu0 }
 0x2a7   : > { %v1666_v33 = vpop.f32.mrb[36].mxu1 }
 0x2a8   : > { %v4190_v28 = vadd.f32 %v1819_v56, %v1666_v33  ;;  %v2847_v57 = vpop.f32.mrb[37].mxu1 }
 0x2a9   : > { %v1669_v59 = vpop.f32.mrb[38].mxu1 }
 0x2aa   : > { %v4192_v19 = vadd.f32 %v1822_v26, %v1669_v59  ;;  %v2848_v40 = vpop.f32.mrb[39].mxu1 }
 0x2ab   : > { %v1835_v46 = vpop.f32.mrb[80].mxu0 }
 0x2ac   : > { %v2907_v16 = vpop.f32.mrb[81].mxu0 }
 0x2ad   : > { %v1838_v0 = vpop.f32.mrb[82].mxu0 }
 0x2ae   : > { %v2908_v20 = vpop.f32.mrb[83].mxu0 }
 0x2b1   : > { %v1674_v41 = vpop.f32.mrb[40].mxu1 }
 0x2b2   : > { %v4194_v31 = vadd.f32 %v1827_v29, %v1674_v41  ;;  %v2851_v43 = vpop.f32.mrb[41].mxu1 }
 0x2b3   : > { %v1677_v24 = vpop.f32.mrb[42].mxu1  ;;  %v1843_v8 = vpop.f32.mrb[84].mxu0 }
 0x2b4   : > { %v4196_v61 = vadd.f32 %v1830_v50, %v1677_v24  ;;  %v2852_v13 = vpop.f32.mrb[43].mxu1  ;;  %v2911_v18 = vpop.f32.mrb[85].mxu0 }
 0x2b5   : > { %v1846_v39 = vpop.f32.mrb[86].mxu0 }
 0x2b6   : > { %v2912_v14 = vpop.f32.mrb[87].mxu0 }
 0x2b9   : > { %v1682_v54 = vpop.f32.mrb[44].mxu1 }
 0x2ba   : > { %v4198_v44 = vadd.f32 %v1835_v46, %v1682_v54  ;;  %v2855_v5 = vpop.f32.mrb[45].mxu1 }
 0x2bb   : > { %v1685_v53 = vpop.f32.mrb[46].mxu1  ;;  %v1851_v15 = vpop.f32.mrb[88].mxu0 }
 0x2bc   : > { %v4200_v3 = vadd.f32 %v1838_v0, %v1685_v53  ;;  %v2856_v37 = vpop.f32.mrb[47].mxu1  ;;  %v2915_v12 = vpop.f32.mrb[89].mxu0  ;;  %v2533_v53 = vld [vmem:[%s3497_s9] sm:$0xff]  }
 0x2bd   : > { %v1854_v55 = vpop.f32.mrb[90].mxu0  ;;  %v4230_v37 = vld [vmem:[%s4361_s4] ss:$0 sm:$0xff] }
 0x2be   : > { %v2916_v34 = vpop.f32.mrb[91].mxu0 }
 0x2c1   : > { %v1690_v42 = vpop.f32.mrb[48].mxu1 }
 0x2c2   : > { %v4202_v63 = vadd.f32 %v1843_v8, %v1690_v42  ;;  %v2859_v4 = vpop.f32.mrb[49].mxu1  ;;  %v2564_v42 = vld [vmem:[%s3497_s9 + $0x8] sm:$0xff]  }
 0x2c3   : > { %v1693_v7 = vpop.f32.mrb[50].mxu1  ;;  %v1859_v10 = vpop.f32.mrb[92].mxu0 }
 0x2c4   : > { %v4204_v6 = vadd.f32 %v1846_v39, %v1693_v7  ;;  %v2860_v1 = vpop.f32.mrb[51].mxu1  ;;  %v2919_v62 = vpop.f32.mrb[93].mxu0 }
 0x2c5   : > { %v1862_v49 = vpop.f32.mrb[94].mxu0  ;;  %v2535_v1 = vunpack.c.h.bf16 %v2533_v53 }
 0x2c6   : > { %v2920_v32 = vpop.f32.mrb[95].mxu0 }
 0x2c7   : > { %v2539_v32 = vunpack.c.h.bf16 %v2564_v42 }
 0x2c9   : > { %v1698_v52 = vpop.f32.mrb[52].mxu1 }
 0x2ca   : > { %v4206_v30 = vadd.f32 %v1851_v15, %v1698_v52  ;;  %v2863_v45 = vpop.f32.mrb[53].mxu1 }
 0x2cb   : > { %v1701_v60 = vpop.f32.mrb[54].mxu1  ;;  %v1867_v22 = vpop.f32.mrb[96].mxu0 }
 0x2cc   : > { %v4208_v48 = vadd.f32 %v1854_v55, %v1701_v60  ;;  %v2864_v21 = vpop.f32.mrb[55].mxu1  ;;  %v2923_v51 = vpop.f32.mrb[97].mxu0  ;;  %v2534_v55 = vunpack.c.l.bf16 %v2533_v53 }
 0x2cd   : > { %v1870_v11 = vpop.f32.mrb[98].mxu0  ;;  %v2157_v51 = vrot.slane %v2539_v32, 6 }
 0x2ce   : > { %v2924_v17 = vpop.f32.mrb[99].mxu0 }
 0x2d1   : > { %v1706_v38 = vpop.f32.mrb[56].mxu1 }
 0x2d2   : > { %v4210_v36 = vadd.f32 %v1859_v10, %v1706_v38  ;;  %v2867_v27 = vpop.f32.mrb[57].mxu1  ;;  %v2565_v38 = vld [vmem:[%s3497_s9 + $0x10] sm:$0xff]  }
 0x2d3   : > { %v1709_v25 = vpop.f32.mrb[58].mxu1  ;;  %v1875_v58 = vpop.f32.mrb[100].mxu0 }
 0x2d4   : > { %v4212_v35 = vadd.f32 %v1862_v49, %v1709_v25  ;;  %v2868_v56 = vpop.f32.mrb[59].mxu1  ;;  %v2927_v9 = vpop.f32.mrb[101].mxu0  ;;  %v2538_v49 = vunpack.c.l.bf16 %v2564_v42 }
 0x2d5   : > { %v1878_v26 = vpop.f32.mrb[102].mxu0 }
 0x2d6   : > { %v2928_v23 = vpop.f32.mrb[103].mxu0  ;;  %v2156_v21 = vrot.slane %v2538_v49, 6 }
 0x2d7   : > { %v2543_v23 = vunpack.c.h.bf16 %v2565_v38 }
 0x2d8   : > { %v2158_v9 = vsel %vm4539_vm4, %v2156_v21, %v2157_v51 }
 0x2d9   : > { %v1714_v29 = vpop.f32.mrb[60].mxu1 }
 0x2da   : > { %v4214_v2 = vadd.f32 %v1867_v22, %v1714_v29  ;;  %v2871_v50 = vpop.f32.mrb[61].mxu1 }
 0x2db   : > { %v1717_v47 = vpop.f32.mrb[62].mxu1  ;;  %v1883_v33 = vpop.f32.mrb[104].mxu0 }
 0x2dc   : > { %v4216_v57 = vadd.f32 %v1870_v11, %v1717_v47  ;;  %v2872_v59 = vpop.f32.mrb[63].mxu1  ;;  %v2931_v40 = vpop.f32.mrb[105].mxu0 }
 0x2dd   : > { %v1886_v46 = vpop.f32.mrb[106].mxu0  ;;  %v2180_v40 = vrot.slane %v2543_v23, 4 }
 0x2de   : > { %v2932_v16 = vpop.f32.mrb[107].mxu0 }
 0x2e1   : > { %v1722_v0 = vpop.f32.mrb[64].mxu1 }
 0x2e2   : > { %v4218_v20 = vadd.f32 %v1875_v58, %v1722_v0  ;;  %v2875_v41 = vpop.f32.mrb[65].mxu1  ;;  %v2566_v0 = vld [vmem:[%s3497_s9 + $0x18] sm:$0xff]  }
 0x2e3   : > { %v1725_v43 = vpop.f32.mrb[66].mxu1 }
 0x2e4   : > { %v4220_v24 = vadd.f32 %v1878_v26, %v1725_v43  ;;  %v2876_v8 = vpop.f32.mrb[67].mxu1  ;;  %v2542_v26 = vunpack.c.l.bf16 %v2565_v38 }
 0x2e6   : > { %v2179_v59 = vrot.slane %v2542_v26, 4  ;;  %v2568_v26 = vld [vmem:[%s3497_s9 + $0x28] sm:$0xff]  }
 0x2e9   : > { %v1730_v13 = vpop.f32.mrb[68].mxu1 }
 0x2ea   : > { %v4222_v18 = vadd.f32 %v1883_v33, %v1730_v13  ;;  %v2879_v39 = vpop.f32.mrb[69].mxu1 }
 0x2eb   : > { %v1733_v14 = vpop.f32.mrb[70].mxu1  ;;  %v2181_v39 = vsel %vm4540_vm2, %v2179_v59, %v2180_v40 }
 0x2ec   : > { %v4224_v54 = vadd.f32 %v1886_v46, %v1733_v14  ;;  %v2880_v5 = vpop.f32.mrb[71].mxu1  ;;  %v2546_v14 = vunpack.c.l.bf16 %v2566_v0 }
 0x2ed   : > { %v2547_v5 = vunpack.c.h.bf16 %v2566_v0 }
 0x2f1   : > { %v2025_v15 = vpop.f32.mrb[72].mxu1 }
 0x2f2   : > { %v2096_v12 = vadd.f32 %v2025_v15, %v4190_v28  ;;  %v2951_v34 = vpop.f32.mrb[73].mxu1 }
 0x2f3   : > { %v2028_v4 = vpop.f32.mrb[74].mxu1 }
 0x2f4   : > { %v2121_v7 = vadd.f32 %v4230_v37, %v2096_v12  ;;  %v2097_v10 = vadd.f32 %v2028_v4, %v4192_v19  ;;  %v2952_v62 = vpop.f32.mrb[75].mxu1  ;;  %v2202_v4 = vrot.slane %v2546_v14, 2 }
 0x2f6   : > { %v2143_v52 = vadd.f32 %v2534_v55, %v2121_v7  ;;  %v2122_v45 = vadd.f32 %v4230_v37, %v2097_v10  ;;  %v2203_v7 = vrot.slane %v2547_v5, 2 }
 0x2f8   : > { %v2145_v60 = vmax.f32 %v2143_v52, 0.0  ;;  %v2144_v22 = vadd.f32 %v2535_v1, %v2122_v45  ;;  %v2204_v45 = vsel %vm4541_vm15, %v2202_v4, %v2203_v7 }
 0x2f9   : > { %v2033_v28 = vpop.f32.mrb[76].mxu1 }
 0x2fa   : > { %2147 = vst [vmem:[%s4238_s28] sm:$0xff] %v2145_v60  ;;  %v2146_v11 = vmax.f32 %v2144_v22, 0.0  ;;  %v2098_v19 = vadd.f32 %v2033_v28, %v4194_v31  ;;  %v2955_v17 = vpop.f32.mrb[77].mxu1 }
 0x2fb   : > { %v2036_v27 = vpop.f32.mrb[78].mxu1 }
 0x2fc   : > { %2148 = vst [vmem:[%s4238_s28 + $0x8] sm:$0xff] %v2146_v11  ;;  %v2123_v25 = vadd.f32 %v4230_v37, %v2098_v19  ;;  %v2099_v58 = vadd.f32 %v2036_v27, %v4196_v61  ;;  %v2956_v56 = vpop.f32.mrb[79].mxu1  ;;  %v2567_v19 = vld [vmem:[%s3497_s9 + $0x20] sm:$0xff]  }
 0x2fd   : > { %v2550_v56 = vunpack.c.l.bf16 %v2567_v19 }
 0x2fe   : > { %v2162_v29 = vadd.f32 %v2156_v21, %v2123_v25  ;;  %v2124_v50 = vadd.f32 %v4230_v37, %v2099_v58 }
 0x300   : > { %v2165_v31 = vmax.f32 %v2162_v29, 0.0  ;;  %v2163_v47 = vadd.f32 %v2158_v9, %v2124_v50 }
 0x301   : > { %v2041_v33 = vpop.f32.mrb[80].mxu1 }
 0x302   : > { %2490 = vst [vmem:[%s4238_s28 + $0xe] sm:$0xfc] %v2165_v31  ;;  %v2166_v46 = vmax.f32 %v2163_v47, 0.0  ;;  %v2100_v16 = vadd.f32 %v2041_v33, %v4198_v44  ;;  %v2959_v61 = vpop.f32.mrb[81].mxu1  ;;  %v2554_v47 = vunpack.c.l.bf16 %v2568_v26 }
 0x303   : > { %v2044_v41 = vpop.f32.mrb[82].mxu1 }
 0x304   : > { %2491 = vst [vmem:[%s4238_s28 + $0x16] sm:$0xff] %v2166_v46  ;;  %v2125_v43 = vadd.f32 %v4230_v37, %v2100_v16  ;;  %v2101_v8 = vadd.f32 %v2044_v41, %v4200_v3  ;;  %v2960_v13 = vpop.f32.mrb[83].mxu1  ;;  %v2555_v16 = vunpack.c.h.bf16 %v2568_v26  ;;  %v2235_v41 = vrot.slane %v2554_v47, 6 }
 0x306   : > { %v2164_v53 = vadd.f32 %v2157_v51, %v2125_v43  ;;  %v2185_v15 = vadd.f32 %v2179_v59, %v2125_v43  ;;  %v2126_v44 = vadd.f32 %v4230_v37, %v2101_v8  ;;  %v2569_v8 = vld [vmem:[%s3497_s9 + $0x30] sm:$0xff]   ;;  %v2236_v14 = vrot.slane %v2555_v16, 6 }
 0x308   : > { %v2167_v12 = vmax.f32 %v2164_v53, 0.0  ;;  %v2188_v55 = vmax.f32 %v2185_v15, 0.0  ;;  %v2186_v34 = vadd.f32 %v2181_v39, %v2126_v44  ;;  %v2558_v53 = vunpack.c.l.bf16 %v2569_v8 }
 0x309   : > { %v2049_v42 = vpop.f32.mrb[84].mxu1 }
 0x30a   : > { %2492 = vst [vmem:[%s4238_s28 + $0x1e] sm:$0x3] %v2167_v12  ;;  %2495 = vst [vmem:[%s4238_s28 + $0x1c] sm:$0xf0] %v2188_v55  ;;  %v2189_v10 = vmax.f32 %v2186_v34, 0.0  ;;  %v2102_v3 = vadd.f32 %v2049_v42, %v4202_v63  ;;  %v2963_v1 = vpop.f32.mrb[85].mxu1  ;;  %v2559_v42 = vunpack.c.h.bf16 %v2569_v8 }
 0x30b   : > { %v2052_v62 = vpop.f32.mrb[86].mxu1  ;;  %v2570_v1 = vld [vmem:[%s3497_s9 + $0x38] sm:$0xff]   ;;  %s3206_s9 = scalar_lea.vmem %s3205_s8, 4096 }
 0x30c   : > { %2496 = vst [vmem:[%s4238_s28 + $0x24] sm:$0xff] %v2189_v10  ;;  %v2127_v49 = vadd.f32 %v4230_v37, %v2102_v3  ;;  %v2103_v32 = vadd.f32 %v2052_v62, %v4204_v6  ;;  %v2964_v52 = vpop.f32.mrb[87].mxu1  ;;  %v2257_v10 = vrot.slane %v2558_v53, 4  ;;  %p3208_p9 = scmp.lt.s32.totalorder %s3206_s9, %s3200_s6 }
 0x30e   : > { %v2187_v60 = vadd.f32 %v2180_v40, %v2127_v49  ;;  %v2208_v22 = vadd.f32 %v2202_v4, %v2127_v49  ;;  %v2128_v28 = vadd.f32 %v4230_v37, %v2103_v32  ;;  %v2551_v40 = vunpack.c.h.bf16 %v2567_v19  ;;  %p3209_p12 = por %p3208_p9, %p3207_p7 }
 0x30f   : > { %v2563_v19 = vunpack.c.h.bf16 %v2570_v1 }
 0x310   : > { %v2190_v21 = vmax.f32 %v2187_v60, 0.0  ;;  %v2211_v63 = vmax.f32 %v2208_v22, 0.0  ;;  %v2209_v51 = vadd.f32 %v2204_v45, %v2128_v28  ;;  %v2562_v60 = vunpack.c.l.bf16 %v2570_v1  ;;  %p3210_p1 = pnand %p3209_p12, %p3203_p3 }
 0x311   : > { %v2057_v11 = vpop.f32.mrb[88].mxu1 }
 0x312   : > { %2497 = vst [vmem:[%s4238_s28 + $0x2c] sm:$0xf] %v2190_v21  ;;  %2500 = vst [vmem:[%s4238_s28 + $0x2a] sm:$0xc0] %v2211_v63  ;;  %v2212_v17 = vmax.f32 %v2209_v51, 0.0  ;;  %v2104_v6 = vadd.f32 %v2057_v11, %v4206_v30  ;;  %v2967_v38 = vpop.f32.mrb[89].mxu1 }
 0x313   : > { %v2060_v27 = vpop.f32.mrb[90].mxu1  ;;  %v2279_v38 = vrot.slane %v2562_v60, 2 }
 0x314   : > { %2501 = vst [vmem:[%s4238_s28 + $0x32] sm:$0xff] %v2212_v17  ;;  %v2129_v25 = vadd.f32 %v4230_v37, %v2104_v6  ;;  %v2105_v58 = vadd.f32 %v2060_v27, %v4208_v48  ;;  %v2968_v9 = vpop.f32.mrb[91].mxu1 }
 0x316   : > { %v2210_v23 = vadd.f32 %v2203_v7, %v2129_v25  ;;  %v2130_v29 = vadd.f32 %v4230_v37, %v2105_v58 }
 0x318   : > { %v2213_v50 = vmax.f32 %v2210_v23, 0.0  ;;  %v2222_v31 = vadd.f32 %v2550_v56, %v2130_v29 }
 0x319   : > { %v2065_v33 = vpop.f32.mrb[92].mxu1 }
 0x31a   : > { %2502 = vst [vmem:[%s4238_s28 + $0x3a] sm:$0x3f] %v2213_v50  ;;  %v2224_v30 = vmax.f32 %v2222_v31, 0.0  ;;  %v2106_v59 = vadd.f32 %v2065_v33, %v4210_v36  ;;  %v2971_v46 = vpop.f32.mrb[93].mxu1 }
 0x31b   : > { %v2068_v48 = vpop.f32.mrb[94].mxu1 }
 0x31c   : > { %2505 = vst [vmem:[%s4238_s28 + $0x40] sm:$0xff] %v2224_v30  ;;  %v2131_v61 = vadd.f32 %v4230_v37, %v2106_v59  ;;  %v2107_v0 = vadd.f32 %v2068_v48, %v4212_v35  ;;  %v2972_v43 = vpop.f32.mrb[95].mxu1  ;;  %v2237_v35 = vsel %vm4542_vm0, %v2235_v41, %v2236_v14 }
 0x31e   : > { %v2223_v13 = vadd.f32 %v2551_v40, %v2131_v61  ;;  %v2132_v39 = vadd.f32 %v4230_v37, %v2107_v0 }
 0x320   : > { %v2225_v5 = vmax.f32 %v2223_v13, 0.0  ;;  %v2241_v36 = vadd.f32 %v2235_v41, %v2132_v39 }
 0x321   : > { %v2073_v15 = vpop.f32.mrb[96].mxu1 }
 0x322   : > { %2506 = vst [vmem:[%s4238_s28 + $0x48] sm:$0xff] %v2225_v5  ;;  %v2244_v44 = vmax.f32 %v2241_v36, 0.0  ;;  %v2108_v12 = vadd.f32 %v2073_v15, %v4214_v2  ;;  %v2975_v55 = vpop.f32.mrb[97].mxu1  ;;  %v2258_v2 = vrot.slane %v2559_v42, 4 }
 0x323   : > { %v2076_v34 = vpop.f32.mrb[98].mxu1 }
 0x324   : > { %2509 = vst [vmem:[%s4238_s28 + $0x4e] sm:$0xfc] %v2244_v44  ;;  %v2133_v4 = vadd.f32 %v4230_v37, %v2108_v12  ;;  %v2109_v7 = vadd.f32 %v2076_v34, %v4216_v57  ;;  %v2976_v3 = vpop.f32.mrb[99].mxu1  ;;  %v2259_v51 = vsel %vm4543_vm7, %v2257_v10, %v2258_v2 }
 0x326   : > { %v2242_v62 = vadd.f32 %v2237_v35, %v2133_v4  ;;  %v2134_v49 = vadd.f32 %v4230_v37, %v2109_v7 }
 0x328   : > { %v2245_v32 = vmax.f32 %v2242_v62, 0.0  ;;  %v2243_v52 = vadd.f32 %v2236_v14, %v2134_v49  ;;  %v2263_v45 = vadd.f32 %v2257_v10, %v2134_v49 }
 0x329   : > { %v2081_v22 = vpop.f32.mrb[100].mxu1 }
 0x32a   : > { %2510 = vst [vmem:[%s4238_s28 + $0x56] sm:$0xff] %v2245_v32  ;;  %v2246_v28 = vmax.f32 %v2243_v52, 0.0  ;;  %v2266_v21 = vmax.f32 %v2263_v45, 0.0  ;;  %v2110_v63 = vadd.f32 %v2081_v22, %v4218_v20  ;;  %v2979_v57 = vpop.f32.mrb[101].mxu1  ;;  %v2280_v20 = vrot.slane %v2563_v19, 2 }
 0x32b   : > { %v2084_v11 = vpop.f32.mrb[102].mxu1 }
 0x32c   : > { %2511 = vst [vmem:[%s4238_s28 + $0x5e] sm:$0x3] %v2246_v28  ;;  %2514 = vst [vmem:[%s4238_s28 + $0x5c] sm:$0xf0] %v2266_v21  ;;  %v2135_v17 = vadd.f32 %v4230_v37, %v2110_v63  ;;  %v2111_v6 = vadd.f32 %v2084_v11, %v4220_v24  ;;  %v2980_v27 = vpop.f32.mrb[103].mxu1  ;;  %v2281_v47 = vsel %vm4544_vm8, %v2279_v38, %v2280_v20 }
 0x32e   : > { %v2264_v25 = vadd.f32 %v2259_v51, %v2135_v17  ;;  %v2136_v58 = vadd.f32 %v4230_v37, %v2111_v6 }
 0x330   : > { %v2267_v56 = vmax.f32 %v2264_v25, 0.0  ;;  %v2265_v9 = vadd.f32 %v2258_v2, %v2136_v58  ;;  %v2285_v26 = vadd.f32 %v2279_v38, %v2136_v58 }
 0x331   : > { %v2089_v23 = vpop.f32.mrb[104].mxu1 }
 0x332   : > { %2515 = vst [vmem:[%s4238_s28 + $0x64] sm:$0xff] %v2267_v56  ;;  %v2268_v29 = vmax.f32 %v2265_v9, 0.0  ;;  %v2288_v50 = vmax.f32 %v2285_v26, 0.0  ;;  %v2112_v31 = vadd.f32 %v2089_v23, %v4222_v18  ;;  %v2983_v24 = vpop.f32.mrb[105].mxu1 }
 0x333   : > { %v2092_v33 = vpop.f32.mrb[106].mxu1 }
 0x334   : > { %2516 = vst [vmem:[%s4238_s28 + $0x6c] sm:$0xf] %v2268_v29  ;;  %2519 = vst [vmem:[%s4238_s28 + $0x6a] sm:$0xc0] %v2288_v50  ;;  %v2137_v30 = vadd.f32 %v4230_v37, %v2112_v31  ;;  %v2113_v59 = vadd.f32 %v2092_v33, %v4224_v54  ;;  %v2984_v40 = vpop.f32.mrb[107].mxu1 }
 0x336   : > { %v2286_v46 = vadd.f32 %v2281_v47, %v2137_v30  ;;  %v2138_v48 = vadd.f32 %v4230_v37, %v2113_v59 }
 0x338   : > { %v2289_v18 = vmax.f32 %v2286_v46, 0.0  ;;  %v2287_v16 = vadd.f32 %v2280_v20, %v2138_v48 }
 0x33a   : > { %2520 = vst [vmem:[%s4238_s28 + $0x72] sm:$0xff] %v2289_v18  ;;  %v2290_v54 = vmax.f32 %v2287_v16, 0.0 }
 0x33c   : > { %2521 = vst [vmem:[%s4238_s28 + $0x7a] sm:$0x3f] %v2290_v54 }
 0x33d   : > { %3213 = shalt.err (!%p3210_p1)
}
 0x33e   : > { %s3214_s24 = scalar_lea.hbm %s4309_s17, 2048  ;;  %s3218_s16 = scalar_lea.hbm %s4362_s5, 4096 }
 0x33f   : > { %p3215_p13 = scmp.ne.s32.totalorder %s4309_s17, %s3214_s24  ;;  %p3219_p4 = scmp.lt.u32.totalorder %s4309_s17, %s4362_s5 }
 0x340   : > { %p3220_p5 = scmp.lt.u32.totalorder %s3218_s16, %s3214_s24  ;;  %p3222_p11 = scmp.lt.u32.totalorder %s3214_s24, %s4309_s17 }
 0x341   : > { %p3216_p6 = pnand %p3215_p13, %p4545_p0 }
 0x342   : > { %p3221_p8 = por %p3220_p5, %p3219_p4 }
 0x343   : > { %p3217_p10 = pneg %p3216_p6 }
 0x344   : > { %p3223_p2 = por %p3222_p11, %p3221_p8 }
 0x346   : > { %p3224_p3 = pnand %p3223_p2, %p3217_p10 }
 0x348   : > { %3227 = shalt.err (!%p3224_p3)
}
 0x349   : > { %s3280_s12 = smov 128   ;;  %s3281_s30 = smov 8  }
 0x34a   : > { %2995 = dma.vmem_to_hbm [thread:$0]  (%p4545_p0), %s4311_s13, 2048, %s4309_s17, %s2296_s7, %s3280_s12, %s3280_s12, %s3281_s30  }
 0x34b PF: > { %s2325_s11 = sand.u32 1, %s3258_s18   ;;  %p4546_p7 = scmp.ne.s32.totalorder %s4392_s25, 0 }
 0x34c   : > { %p4547_p9 = scmp.ge.s32.totalorder %s3270_s21, 2  ;;  %s2326_s6 = scalar_lea.sflag [#allocation6], %s2325_s11 }
 0x34e   : > { %p3009_p12 = pnand %p4547_p9, %p4546_p7 }
 0x350   : > { %3253 = dma.done.wait (!%p3009_p12), %s2326_s6, 2048  }
 0x351   : > { %3255 = vsyncadd (!%p3009_p12), %s2326_s6, 4294965248  ;;  %p19_p1 = scmp.ge.s32.totalorder %s3428_s29, 4   ;;  %s4548_s18 = smov %s3262_s19 }
 0x352   : > { %s4549_s19 = smov %s3266_s20  ;;  %s4550_s20 = smov %s3444_s27 }
 0x353   : > { %s4551_s21 = smov %s3428_s29  ;;  %21 = sbr.rel (!%p19_p1) target bundleno = 6 (0x6), region = 111 }
 0x35a   :  { %2331 = vsyncpa [#allocation5], 1 }
 0x35b   :  { %2333 = vsyncpa [#allocation5 + $0x1], 1 }
 0x35c   :  { %2334 = vsyncpa [#allocation8], 1 }
 0x35d   :  { %2335 = vsyncpa [#allocation6], 1 }
 0x35e   :  { %2337 = vsyncpa [#allocation6 + $0x1], 1 }

</bundles_post_ra>
